<compile_context>
chip_gen: v7x
topology: tpu7x:2x2x1
jax: 0.10.0
libtpu: 0.0.40
codegen_flags: <defaults>
</compile_context>

<pallas_src>
import math
from functools import partial

import numpy as np
import jax
import jax.numpy as jnp
from jax import lax
from jax.experimental import pallas as pl
from jax.experimental.pallas import tpu as pltpu

# ------------------------- configuration (small) --------------------------
B = 2                     # batch
IN_CHANS = 3
IMG = 16                  # image size (w == h, matches pos_embed grid)
PATCH = 8
EMBED = 32                # embed_dim
DEPTH = 2
HEADS = 4
MLP_RATIO = 4.0
NUM_ELE_SLICE = 16
PER_LI = np.linspace(-1.0, 1.0, 15).tolist()   # elevation thresholds (sorted)
NUM_PATCHES = (IMG // PATCH) ** 2              # 4
SEQ = NUM_PATCHES + 1                          # cls + patches = 5
LN_EPS = 1e-5             # nn.LayerNorm default eps


# ------------------------------- kernel ------------------------------------


def _layernorm(v, w, b, eps):
    mu = jnp.mean(v, axis=-1, keepdims=True)
    var = jnp.mean(jnp.square(v - mu), axis=-1, keepdims=True)
    return (v - mu) / jnp.sqrt(var + eps) * w + b


def fused_vit_kernel(x0_ref, pw_ref, base_ref, bias_ref, sel_ref,
                     ln1w_ref, ln1b_ref, qkvw_ref, projw_ref, projb_ref,
                     ln2w_ref, ln2b_ref, fc1w_ref, fc1b_ref, fc2w_ref, fc2b_ref,
                     normw_ref, normb_ref, o_ref,
                     *, num_heads, scale, eps, depth, dim):
    """Entire forward pass (patch embed -> blocks -> final LN of cls rows)."""
    hd = dim // num_heads
    inv_sqrt2 = np.float32(1.0 / math.sqrt(2.0))

    # Patch-embed matmul + token assembly.  x0 has a zero row in every cls
    # slot; `base` carries cls token + conv bias + pos embed + elevation enc.
    x = (jnp.dot(x0_ref[...], pw_ref[...], preferred_element_type=jnp.float32)
         + base_ref[...])                                     # (B*S, D)
    attn_bias = bias_ref[...]                                 # (B*S, B*S) block-diag mask

    for d in range(depth):                                    # DEPTH=2, unrolled
        # ---------------- MHSA ----------------
        xn = _layernorm(x, ln1w_ref[d], ln1b_ref[d], eps)
        qkv = jnp.dot(xn, qkvw_ref[d], preferred_element_type=jnp.float32)  # (B*S, 3D)
        head_outs = []
        for h in range(num_heads):                            # HEADS=4, unrolled
            q = qkv[:, h * hd:(h + 1) * hd]
            k = qkv[:, dim + h * hd:dim + (h + 1) * hd]
            v = qkv[:, 2 * dim + h * hd:2 * dim + (h + 1) * hd]
            # q @ k^T across the whole folded batch; off-batch pairs masked out
            att = lax.dot_general(q, k, (((1,), (1,)), ((), ())),
                                  preferred_element_type=jnp.float32) * scale
            att = att + attn_bias
            att = att - jnp.max(att, axis=-1, keepdims=True)
            att = jnp.exp(att)
            att = att * pl.reciprocal(jnp.sum(att, axis=-1, keepdims=True),
                                      approx=True)
            head_outs.append(jnp.dot(att, v, preferred_element_type=jnp.float32))
        attn = jnp.concatenate(head_outs, axis=-1)            # (B*S, D)
        attn = (jnp.dot(attn, projw_ref[d], preferred_element_type=jnp.float32)
                + projb_ref[d])
        x = x + attn

        # ---------------- MLP ----------------
        xn2 = _layernorm(x, ln2w_ref[d], ln2b_ref[d], eps)
        h1 = (jnp.dot(xn2, fc1w_ref[d], preferred_element_type=jnp.float32)
              + fc1b_ref[d])
        # exact GELU (PyTorch nn.GELU default): 0.5*x*(1+erf(x/sqrt(2)))
        h1 = 0.5 * h1 * (1.0 + lax.erf(h1 * inv_sqrt2))
        h2 = (jnp.dot(h1, fc2w_ref[d], preferred_element_type=jnp.float32)
              + fc2b_ref[d])
        x = x + h2

    # cls-row selection via one tiny matmul, final LayerNorm, single store
    cls = jnp.dot(sel_ref[...], x, preferred_element_type=jnp.float32)  # (B, D)
    o_ref[...] = _layernorm(cls, normw_ref[...], normb_ref[...], eps).astype(o_ref.dtype)


# ------------------------------ forward ------------------------------------


def forward(x_img, x_g_norm, params):
    Bn, C, H, W = x_img.shape
    Bg = x_g_norm.shape[0]
    assert Bn % Bg == 0, "batch of x must be a multiple of batch of x_g_norm"
    p = PATCH
    nh, nw = H // p, W // p
    N = nh * nw
    S = N + 1
    D = EMBED
    CPP = C * p * p

    # ---- XLA glue (fuses; no standalone Pallas launches) ----

    # im2col with a zero row in the cls slot of every image
    patches = (x_img.reshape(Bn, C, nh, p, nw, p)
               .transpose(0, 2, 4, 1, 3, 5)
               .reshape(Bn, N, CPP))
    x0 = jnp.concatenate(
        [jnp.zeros((Bn, 1, CPP), jnp.float32), patches], axis=1).reshape(Bn * S, CPP)

    # Conv2d(kernel=stride=patch) weight as a matmul: (D, C, p, p) -> (CPP, D)
    w_mat = params["conv_w"].reshape(D, CPP).T

    # elevation encoding: AvgPool2d(kernel=stride=patch) of channel 0,
    # bisect_left against per_li, gather eleva_embed rows (cls slot stays 0)
    pooled0 = (x_g_norm[:, 0].reshape(Bg, nh, p, nw, p)
               .mean(axis=(2, 4)).reshape(Bg, N))
    idx = jnp.searchsorted(jnp.asarray(PER_LI, jnp.float32), pooled0,
                           side="left")                      # == bisect_left
    ele_patch = params["eleva_embed"][idx]                   # (Bg, N, D)
    ele = jnp.concatenate(
        [jnp.zeros((Bg, 1, D), jnp.float32), ele_patch], axis=1)   # (Bg, S, D)
    ele = jnp.tile(ele, (Bn // Bg, 1, 1))                    # repeat over batch

    # base = cls-token row + conv-bias rows + pos embed + elevation encoding
    # (image grid matches pos_embed grid, so no bicubic resize is needed)
    # TODO(synk): bicubic pos-embed resize branch (npatch != N or w != h) not implemented.
    pos = params["pos_embed"][0]                             # (S, D)
    cls_rows = jnp.concatenate(
        [params["cls_token"][0], jnp.zeros((N, D), jnp.float32)], axis=0)
    bias_rows = jnp.concatenate(
        [jnp.zeros((1, D), jnp.float32),
         jnp.broadcast_to(params["conv_b"][None, :], (N, D))], axis=0)
    base = ((cls_rows + bias_rows + pos)[None, :, :] + ele).reshape(Bn * S, D)

    # block-diagonal additive attention mask over the folded batch dim
    bidx = jnp.repeat(jnp.arange(Bn), S)
    attn_bias = jnp.where(bidx[:, None] == bidx[None, :], 0.0,
                          -1e30).astype(jnp.float32)         # (B*S, B*S)

    # cls-row selector: picks rows {b*S} out of the (B*S, D) activation slab
    sel = jnp.zeros((Bn, Bn * S), jnp.float32).at[
        jnp.arange(Bn), jnp.arange(Bn) * S].set(1.0)

    # ---- single fused Pallas kernel ----
    kernel = partial(fused_vit_kernel, num_heads=HEADS,
                     scale=(D // HEADS) ** -0.5, eps=LN_EPS, depth=DEPTH, dim=D)
    out = pl.pallas_call(
        kernel,
        out_shape=jax.ShapeDtypeStruct((Bn, D), jnp.float32),
    )(x0, w_mat, base, attn_bias, sel,
      params["ln1_w"], params["ln1_b"], params["qkv_w"],
      params["proj_w"], params["proj_b"],
      params["ln2_w"], params["ln2_b"],
      params["fc1_w"], params["fc1_b"], params["fc2_w"], params["fc2_b"],
      params["norm_w"], params["norm_b"])
    return out


# --------------------------- parameter init --------------------------------


def init_params(key):
    keys = iter(jax.random.split(key, 16))

    def tn(shape, std=0.02):
        return std * jax.random.truncated_normal(next(keys), -2.0, 2.0, shape,
                                                 jnp.float32)

    D = EMBED
    MH = int(D * MLP_RATIO)
    return dict(
        conv_w=tn((D, IN_CHANS, PATCH, PATCH)),
        conv_b=jnp.zeros((D,), jnp.float32),
        cls_token=tn((1, 1, D)),
        pos_embed=tn((1, SEQ, D)),
        eleva_embed=tn((NUM_ELE_SLICE, D)),
        # per-block params stacked over depth; linear weights stored
        # pre-transposed so y = x @ W inside the kernel (qkv has no bias)
        ln1_w=jnp.ones((DEPTH, 1, D), jnp.float32),
        ln1_b=jnp.zeros((DEPTH, 1, D), jnp.float32),
        qkv_w=tn((DEPTH, D, 3 * D)),
        proj_w=tn((DEPTH, D, D)),
        proj_b=jnp.zeros((DEPTH, 1, D), jnp.float32),
        ln2_w=jnp.ones((DEPTH, 1, D), jnp.float32),
        ln2_b=jnp.zeros((DEPTH, 1, D), jnp.float32),
        fc1_w=tn((DEPTH, D, MH)),
        fc1_b=jnp.zeros((DEPTH, 1, MH), jnp.float32),
        fc2_w=tn((DEPTH, MH, D)),
        fc2_b=jnp.zeros((DEPTH, 1, D), jnp.float32),
        norm_w=jnp.ones((1, D), jnp.float32),
        norm_b=jnp.zeros((1, D), jnp.float32),
    )


# --------------------------------- main -------------------------------------

if __name__ == "__main__":
    k1, k2, k3 = jax.random.split(jax.random.PRNGKey(0), 3)
    x = jax.random.normal(k1, (B, IN_CHANS, IMG, IMG), jnp.float32)
    x_g_norm = jax.random.normal(k2, (B, IN_CHANS, IMG, IMG), jnp.float32)
    params = init_params(k3)

    out = jax.jit(forward)(x, x_g_norm, params)
    out = jax.block_until_ready(out)
    assert out.shape == (B, EMBED), out.shape
    assert bool(jnp.all(jnp.isfinite(out)))
    print("KERNEL_OK")
</pallas_src>

<mosaic_0001>
module attributes {stable_mosaic.version = 11 : i64} {
  func.func @fused_vit_kernel(%arg0: memref<10x192xf32, #tpu.memory_space<vmem>>, %arg1: memref<192x32xf32, #tpu.memory_space<vmem>>, %arg2: memref<10x32xf32, #tpu.memory_space<vmem>>, %arg3: memref<10x10xf32, #tpu.memory_space<vmem>>, %arg4: memref<2x10xf32, #tpu.memory_space<vmem>>, %arg5: memref<2x1x32xf32, #tpu.memory_space<vmem>>, %arg6: memref<2x1x32xf32, #tpu.memory_space<vmem>>, %arg7: memref<2x32x96xf32, #tpu.memory_space<vmem>>, %arg8: memref<2x32x32xf32, #tpu.memory_space<vmem>>, %arg9: memref<2x1x32xf32, #tpu.memory_space<vmem>>, %arg10: memref<2x1x32xf32, #tpu.memory_space<vmem>>, %arg11: memref<2x1x32xf32, #tpu.memory_space<vmem>>, %arg12: memref<2x32x128xf32, #tpu.memory_space<vmem>>, %arg13: memref<2x1x128xf32, #tpu.memory_space<vmem>>, %arg14: memref<2x128x32xf32, #tpu.memory_space<vmem>>, %arg15: memref<2x1x32xf32, #tpu.memory_space<vmem>>, %arg16: memref<1x32xf32, #tpu.memory_space<vmem>>, %arg17: memref<1x32xf32, #tpu.memory_space<vmem>>, %arg18: memref<2x32xf32, #tpu.memory_space<vmem>>) attributes {dimension_semantics = [], scalar_prefetch = 0 : i64, scratch_operands = 0 : i64, tpu.core_type = #tpu.core_type<tc>} {
    %c0 = arith.constant 0 : index
    %c0_0 = arith.constant 0 : index
    %0 = vector.load %arg0[%c0, %c0_0] : memref<10x192xf32, #tpu.memory_space<vmem>>, vector<10x192xf32>
    %c0_1 = arith.constant 0 : index
    %c0_2 = arith.constant 0 : index
    %1 = vector.load %arg1[%c0_1, %c0_2] : memref<192x32xf32, #tpu.memory_space<vmem>>, vector<192x32xf32>
    %cst = arith.constant dense<0.000000e+00> : vector<10x32xf32>
    %2 = tpu.matmul %0, %1, %cst {dimension_numbers = #tpu.dot_dimension_numbers<[1], [0], [0], [1], [0, 0, 1, 1], [], []>} : vector<10x192xf32>, vector<192x32xf32>, vector<10x32xf32> -> vector<10x32xf32>
    %c0_3 = arith.constant 0 : index
    %c0_4 = arith.constant 0 : index
    %3 = vector.load %arg2[%c0_3, %c0_4] : memref<10x32xf32, #tpu.memory_space<vmem>>, vector<10x32xf32>
    %4 = arith.addf %2, %3 : vector<10x32xf32>
    %c0_5 = arith.constant 0 : index
    %c0_6 = arith.constant 0 : index
    %5 = vector.load %arg3[%c0_5, %c0_6] : memref<10x10xf32, #tpu.memory_space<vmem>>, vector<10x10xf32>
    %c0_7 = arith.constant 0 : index
    %c0_8 = arith.constant 0 : index
    %c0_9 = arith.constant 0 : index
    %6 = vector.load %arg5[%c0_7, %c0_8, %c0_9] : memref<2x1x32xf32, #tpu.memory_space<vmem>>, vector<1x1x32xf32>
    %7 = vector.shape_cast %6 : vector<1x1x32xf32> to vector<1x32xf32>
    %c0_10 = arith.constant 0 : index
    %c0_11 = arith.constant 0 : index
    %c0_12 = arith.constant 0 : index
    %8 = vector.load %arg6[%c0_10, %c0_11, %c0_12] : memref<2x1x32xf32, #tpu.memory_space<vmem>>, vector<1x1x32xf32>
    %9 = vector.shape_cast %8 : vector<1x1x32xf32> to vector<1x32xf32>
    %cst_13 = arith.constant dense<0.000000e+00> : vector<10xf32>
    %10 = vector.multi_reduction <add>, %4, %cst_13 [1] : vector<10x32xf32> to vector<10xf32>
    %11 = vector.shape_cast %10 : vector<10xf32> to vector<10x1xf32>
    %cst_14 = arith.constant 3.200000e+01 : f32
    %12 = vector.broadcast %cst_14 : f32 to vector<10x1xf32>
    %13 = arith.divf %11, %12 : vector<10x1xf32>
    %14 = vector.broadcast %13 : vector<10x1xf32> to vector<10x32xf32>
    %15 = arith.subf %4, %14 : vector<10x32xf32>
    %16 = arith.mulf %15, %15 : vector<10x32xf32>
    %cst_15 = arith.constant dense<0.000000e+00> : vector<10xf32>
    %17 = vector.multi_reduction <add>, %16, %cst_15 [1] : vector<10x32xf32> to vector<10xf32>
    %18 = vector.shape_cast %17 : vector<10xf32> to vector<10x1xf32>
    %cst_16 = arith.constant 3.200000e+01 : f32
    %19 = vector.broadcast %cst_16 : f32 to vector<10x1xf32>
    %20 = arith.divf %18, %19 : vector<10x1xf32>
    %21 = vector.broadcast %13 : vector<10x1xf32> to vector<10x32xf32>
    %22 = arith.subf %4, %21 : vector<10x32xf32>
    %cst_17 = arith.constant 9.99999974E-6 : f32
    %23 = vector.broadcast %cst_17 : f32 to vector<10x1xf32>
    %24 = arith.addf %20, %23 : vector<10x1xf32>
    %25 = math.sqrt %24 : vector<10x1xf32>
    %26 = vector.broadcast %25 : vector<10x1xf32> to vector<10x32xf32>
    %27 = arith.divf %22, %26 : vector<10x32xf32>
    %28 = vector.broadcast %7 : vector<1x32xf32> to vector<10x32xf32>
    %29 = arith.mulf %27, %28 : vector<10x32xf32>
    %30 = vector.broadcast %9 : vector<1x32xf32> to vector<10x32xf32>
    %31 = arith.addf %29, %30 : vector<10x32xf32>
    %c0_18 = arith.constant 0 : index
    %c0_19 = arith.constant 0 : index
    %c0_20 = arith.constant 0 : index
    %32 = vector.load %arg7[%c0_18, %c0_19, %c0_20] : memref<2x32x96xf32, #tpu.memory_space<vmem>>, vector<1x32x96xf32>
    %33 = vector.shape_cast %32 : vector<1x32x96xf32> to vector<32x96xf32>
    %cst_21 = arith.constant dense<0.000000e+00> : vector<10x96xf32>
    %34 = tpu.matmul %31, %33, %cst_21 {dimension_numbers = #tpu.dot_dimension_numbers<[1], [0], [0], [1], [0, 0, 1, 1], [], []>} : vector<10x32xf32>, vector<32x96xf32>, vector<10x96xf32> -> vector<10x96xf32>
    %35 = vector.extract_strided_slice %34 {offsets = [0, 0], sizes = [10, 8], strides = [1, 1]} : vector<10x96xf32> to vector<10x8xf32>
    %36 = vector.extract_strided_slice %34 {offsets = [0, 32], sizes = [10, 8], strides = [1, 1]} : vector<10x96xf32> to vector<10x8xf32>
    %37 = vector.extract_strided_slice %34 {offsets = [0, 64], sizes = [10, 8], strides = [1, 1]} : vector<10x96xf32> to vector<10x8xf32>
    %cst_22 = arith.constant dense<0.000000e+00> : vector<10x10xf32>
    %38 = tpu.matmul %35, %36, %cst_22 {dimension_numbers = #tpu.dot_dimension_numbers<[1], [1], [0], [0], [0, 0, 1, 0], [], []>} : vector<10x8xf32>, vector<10x8xf32>, vector<10x10xf32> -> vector<10x10xf32>
    %cst_23 = arith.constant 0.353553385 : f32
    %39 = vector.broadcast %cst_23 : f32 to vector<10x10xf32>
    %40 = arith.mulf %38, %39 : vector<10x10xf32>
    %41 = arith.addf %40, %5 : vector<10x10xf32>
    %cst_24 = arith.constant dense<0xFF800000> : vector<10xf32>
    %42 = vector.multi_reduction <maximumf>, %41, %cst_24 [1] : vector<10x10xf32> to vector<10xf32>
    %43 = vector.shape_cast %42 : vector<10xf32> to vector<10x1xf32>
    %44 = vector.broadcast %43 : vector<10x1xf32> to vector<10x10xf32>
    %45 = arith.subf %41, %44 : vector<10x10xf32>
    %46 = math.exp %45 : vector<10x10xf32>
    %cst_25 = arith.constant dense<0.000000e+00> : vector<10xf32>
    %47 = vector.multi_reduction <add>, %46, %cst_25 [1] : vector<10x10xf32> to vector<10xf32>
    %48 = vector.shape_cast %47 : vector<10xf32> to vector<10x1xf32>
    %49 = tpu.reciprocal %48 {approx = true} : vector<10x1xf32> -> vector<10x1xf32>
    %50 = vector.broadcast %49 : vector<10x1xf32> to vector<10x10xf32>
    %51 = arith.mulf %46, %50 : vector<10x10xf32>
    %cst_26 = arith.constant dense<0.000000e+00> : vector<10x8xf32>
    %52 = tpu.matmul %51, %37, %cst_26 {dimension_numbers = #tpu.dot_dimension_numbers<[1], [0], [0], [1], [0, 0, 1, 1], [], []>} : vector<10x10xf32>, vector<10x8xf32>, vector<10x8xf32> -> vector<10x8xf32>
    %53 = vector.extract_strided_slice %34 {offsets = [0, 8], sizes = [10, 8], strides = [1, 1]} : vector<10x96xf32> to vector<10x8xf32>
    %54 = vector.extract_strided_slice %34 {offsets = [0, 40], sizes = [10, 8], strides = [1, 1]} : vector<10x96xf32> to vector<10x8xf32>
    %55 = vector.extract_strided_slice %34 {offsets = [0, 72], sizes = [10, 8], strides = [1, 1]} : vector<10x96xf32> to vector<10x8xf32>
    %cst_27 = arith.constant dense<0.000000e+00> : vector<10x10xf32>
    %56 = tpu.matmul %53, %54, %cst_27 {dimension_numbers = #tpu.dot_dimension_numbers<[1], [1], [0], [0], [0, 0, 1, 0], [], []>} : vector<10x8xf32>, vector<10x8xf32>, vector<10x10xf32> -> vector<10x10xf32>
    %cst_28 = arith.constant 0.353553385 : f32
    %57 = vector.broadcast %cst_28 : f32 to vector<10x10xf32>
    %58 = arith.mulf %56, %57 : vector<10x10xf32>
    %59 = arith.addf %58, %5 : vector<10x10xf32>
    %cst_29 = arith.constant dense<0xFF800000> : vector<10xf32>
    %60 = vector.multi_reduction <maximumf>, %59, %cst_29 [1] : vector<10x10xf32> to vector<10xf32>
    %61 = vector.shape_cast %60 : vector<10xf32> to vector<10x1xf32>
    %62 = vector.broadcast %61 : vector<10x1xf32> to vector<10x10xf32>
    %63 = arith.subf %59, %62 : vector<10x10xf32>
    %64 = math.exp %63 : vector<10x10xf32>
    %cst_30 = arith.constant dense<0.000000e+00> : vector<10xf32>
    %65 = vector.multi_reduction <add>, %64, %cst_30 [1] : vector<10x10xf32> to vector<10xf32>
    %66 = vector.shape_cast %65 : vector<10xf32> to vector<10x1xf32>
    %67 = tpu.reciprocal %66 {approx = true} : vector<10x1xf32> -> vector<10x1xf32>
    %68 = vector.broadcast %67 : vector<10x1xf32> to vector<10x10xf32>
    %69 = arith.mulf %64, %68 : vector<10x10xf32>
    %cst_31 = arith.constant dense<0.000000e+00> : vector<10x8xf32>
    %70 = tpu.matmul %69, %55, %cst_31 {dimension_numbers = #tpu.dot_dimension_numbers<[1], [0], [0], [1], [0, 0, 1, 1], [], []>} : vector<10x10xf32>, vector<10x8xf32>, vector<10x8xf32> -> vector<10x8xf32>
    %71 = vector.extract_strided_slice %34 {offsets = [0, 16], sizes = [10, 8], strides = [1, 1]} : vector<10x96xf32> to vector<10x8xf32>
    %72 = vector.extract_strided_slice %34 {offsets = [0, 48], sizes = [10, 8], strides = [1, 1]} : vector<10x96xf32> to vector<10x8xf32>
    %73 = vector.extract_strided_slice %34 {offsets = [0, 80], sizes = [10, 8], strides = [1, 1]} : vector<10x96xf32> to vector<10x8xf32>
    %cst_32 = arith.constant dense<0.000000e+00> : vector<10x10xf32>
    %74 = tpu.matmul %71, %72, %cst_32 {dimension_numbers = #tpu.dot_dimension_numbers<[1], [1], [0], [0], [0, 0, 1, 0], [], []>} : vector<10x8xf32>, vector<10x8xf32>, vector<10x10xf32> -> vector<10x10xf32>
    %cst_33 = arith.constant 0.353553385 : f32
    %75 = vector.broadcast %cst_33 : f32 to vector<10x10xf32>
    %76 = arith.mulf %74, %75 : vector<10x10xf32>
    %77 = arith.addf %76, %5 : vector<10x10xf32>
    %cst_34 = arith.constant dense<0xFF800000> : vector<10xf32>
    %78 = vector.multi_reduction <maximumf>, %77, %cst_34 [1] : vector<10x10xf32> to vector<10xf32>
    %79 = vector.shape_cast %78 : vector<10xf32> to vector<10x1xf32>
    %80 = vector.broadcast %79 : vector<10x1xf32> to vector<10x10xf32>
    %81 = arith.subf %77, %80 : vector<10x10xf32>
    %82 = math.exp %81 : vector<10x10xf32>
    %cst_35 = arith.constant dense<0.000000e+00> : vector<10xf32>
    %83 = vector.multi_reduction <add>, %82, %cst_35 [1] : vector<10x10xf32> to vector<10xf32>
    %84 = vector.shape_cast %83 : vector<10xf32> to vector<10x1xf32>
    %85 = tpu.reciprocal %84 {approx = true} : vector<10x1xf32> -> vector<10x1xf32>
    %86 = vector.broadcast %85 : vector<10x1xf32> to vector<10x10xf32>
    %87 = arith.mulf %82, %86 : vector<10x10xf32>
    %cst_36 = arith.constant dense<0.000000e+00> : vector<10x8xf32>
    %88 = tpu.matmul %87, %73, %cst_36 {dimension_numbers = #tpu.dot_dimension_numbers<[1], [0], [0], [1], [0, 0, 1, 1], [], []>} : vector<10x10xf32>, vector<10x8xf32>, vector<10x8xf32> -> vector<10x8xf32>
    %89 = vector.extract_strided_slice %34 {offsets = [0, 24], sizes = [10, 8], strides = [1, 1]} : vector<10x96xf32> to vector<10x8xf32>
    %90 = vector.extract_strided_slice %34 {offsets = [0, 56], sizes = [10, 8], strides = [1, 1]} : vector<10x96xf32> to vector<10x8xf32>
    %91 = vector.extract_strided_slice %34 {offsets = [0, 88], sizes = [10, 8], strides = [1, 1]} : vector<10x96xf32> to vector<10x8xf32>
    %cst_37 = arith.constant dense<0.000000e+00> : vector<10x10xf32>
    %92 = tpu.matmul %89, %90, %cst_37 {dimension_numbers = #tpu.dot_dimension_numbers<[1], [1], [0], [0], [0, 0, 1, 0], [], []>} : vector<10x8xf32>, vector<10x8xf32>, vector<10x10xf32> -> vector<10x10xf32>
    %cst_38 = arith.constant 0.353553385 : f32
    %93 = vector.broadcast %cst_38 : f32 to vector<10x10xf32>
    %94 = arith.mulf %92, %93 : vector<10x10xf32>
    %95 = arith.addf %94, %5 : vector<10x10xf32>
    %cst_39 = arith.constant dense<0xFF800000> : vector<10xf32>
    %96 = vector.multi_reduction <maximumf>, %95, %cst_39 [1] : vector<10x10xf32> to vector<10xf32>
    %97 = vector.shape_cast %96 : vector<10xf32> to vector<10x1xf32>
    %98 = vector.broadcast %97 : vector<10x1xf32> to vector<10x10xf32>
    %99 = arith.subf %95, %98 : vector<10x10xf32>
    %100 = math.exp %99 : vector<10x10xf32>
    %cst_40 = arith.constant dense<0.000000e+00> : vector<10xf32>
    %101 = vector.multi_reduction <add>, %100, %cst_40 [1] : vector<10x10xf32> to vector<10xf32>
    %102 = vector.shape_cast %101 : vector<10xf32> to vector<10x1xf32>
    %103 = tpu.reciprocal %102 {approx = true} : vector<10x1xf32> -> vector<10x1xf32>
    %104 = vector.broadcast %103 : vector<10x1xf32> to vector<10x10xf32>
    %105 = arith.mulf %100, %104 : vector<10x10xf32>
    %cst_41 = arith.constant dense<0.000000e+00> : vector<10x8xf32>
    %106 = tpu.matmul %105, %91, %cst_41 {dimension_numbers = #tpu.dot_dimension_numbers<[1], [0], [0], [1], [0, 0, 1, 1], [], []>} : vector<10x10xf32>, vector<10x8xf32>, vector<10x8xf32> -> vector<10x8xf32>
    %107 = tpu.concatenate %52, %70, %88, %106 in 1 : vector<10x8xf32>, vector<10x8xf32>, vector<10x8xf32>, vector<10x8xf32> -> vector<10x32xf32>
    %c0_42 = arith.constant 0 : index
    %c0_43 = arith.constant 0 : index
    %c0_44 = arith.constant 0 : index
    %108 = vector.load %arg8[%c0_42, %c0_43, %c0_44] : memref<2x32x32xf32, #tpu.memory_space<vmem>>, vector<1x32x32xf32>
    %109 = vector.shape_cast %108 : vector<1x32x32xf32> to vector<32x32xf32>
    %cst_45 = arith.constant dense<0.000000e+00> : vector<10x32xf32>
    %110 = tpu.matmul %107, %109, %cst_45 {dimension_numbers = #tpu.dot_dimension_numbers<[1], [0], [0], [1], [0, 0, 1, 1], [], []>} : vector<10x32xf32>, vector<32x32xf32>, vector<10x32xf32> -> vector<10x32xf32>
    %c0_46 = arith.constant 0 : index
    %c0_47 = arith.constant 0 : index
    %c0_48 = arith.constant 0 : index
    %111 = vector.load %arg9[%c0_46, %c0_47, %c0_48] : memref<2x1x32xf32, #tpu.memory_space<vmem>>, vector<1x1x32xf32>
    %112 = vector.shape_cast %111 : vector<1x1x32xf32> to vector<1x32xf32>
    %113 = vector.broadcast %112 : vector<1x32xf32> to vector<10x32xf32>
    %114 = arith.addf %110, %113 : vector<10x32xf32>
    %115 = arith.addf %4, %114 : vector<10x32xf32>
    %c0_49 = arith.constant 0 : index
    %c0_50 = arith.constant 0 : index
    %c0_51 = arith.constant 0 : index
    %116 = vector.load %arg10[%c0_49, %c0_50, %c0_51] : memref<2x1x32xf32, #tpu.memory_space<vmem>>, vector<1x1x32xf32>
    %117 = vector.shape_cast %116 : vector<1x1x32xf32> to vector<1x32xf32>
    %c0_52 = arith.constant 0 : index
    %c0_53 = arith.constant 0 : index
    %c0_54 = arith.constant 0 : index
    %118 = vector.load %arg11[%c0_52, %c0_53, %c0_54] : memref<2x1x32xf32, #tpu.memory_space<vmem>>, vector<1x1x32xf32>
    %119 = vector.shape_cast %118 : vector<1x1x32xf32> to vector<1x32xf32>
    %cst_55 = arith.constant dense<0.000000e+00> : vector<10xf32>
    %120 = vector.multi_reduction <add>, %115, %cst_55 [1] : vector<10x32xf32> to vector<10xf32>
    %121 = vector.shape_cast %120 : vector<10xf32> to vector<10x1xf32>
    %cst_56 = arith.constant 3.200000e+01 : f32
    %122 = vector.broadcast %cst_56 : f32 to vector<10x1xf32>
    %123 = arith.divf %121, %122 : vector<10x1xf32>
    %124 = vector.broadcast %123 : vector<10x1xf32> to vector<10x32xf32>
    %125 = arith.subf %115, %124 : vector<10x32xf32>
    %126 = arith.mulf %125, %125 : vector<10x32xf32>
    %cst_57 = arith.constant dense<0.000000e+00> : vector<10xf32>
    %127 = vector.multi_reduction <add>, %126, %cst_57 [1] : vector<10x32xf32> to vector<10xf32>
    %128 = vector.shape_cast %127 : vector<10xf32> to vector<10x1xf32>
    %cst_58 = arith.constant 3.200000e+01 : f32
    %129 = vector.broadcast %cst_58 : f32 to vector<10x1xf32>
    %130 = arith.divf %128, %129 : vector<10x1xf32>
    %131 = vector.broadcast %123 : vector<10x1xf32> to vector<10x32xf32>
    %132 = arith.subf %115, %131 : vector<10x32xf32>
    %cst_59 = arith.constant 9.99999974E-6 : f32
    %133 = vector.broadcast %cst_59 : f32 to vector<10x1xf32>
    %134 = arith.addf %130, %133 : vector<10x1xf32>
    %135 = math.sqrt %134 : vector<10x1xf32>
    %136 = vector.broadcast %135 : vector<10x1xf32> to vector<10x32xf32>
    %137 = arith.divf %132, %136 : vector<10x32xf32>
    %138 = vector.broadcast %117 : vector<1x32xf32> to vector<10x32xf32>
    %139 = arith.mulf %137, %138 : vector<10x32xf32>
    %140 = vector.broadcast %119 : vector<1x32xf32> to vector<10x32xf32>
    %141 = arith.addf %139, %140 : vector<10x32xf32>
    %c0_60 = arith.constant 0 : index
    %c0_61 = arith.constant 0 : index
    %c0_62 = arith.constant 0 : index
    %142 = vector.load %arg12[%c0_60, %c0_61, %c0_62] : memref<2x32x128xf32, #tpu.memory_space<vmem>>, vector<1x32x128xf32>
    %143 = vector.shape_cast %142 : vector<1x32x128xf32> to vector<32x128xf32>
    %cst_63 = arith.constant dense<0.000000e+00> : vector<10x128xf32>
    %144 = tpu.matmul %141, %143, %cst_63 {dimension_numbers = #tpu.dot_dimension_numbers<[1], [0], [0], [1], [0, 0, 1, 1], [], []>} : vector<10x32xf32>, vector<32x128xf32>, vector<10x128xf32> -> vector<10x128xf32>
    %c0_64 = arith.constant 0 : index
    %c0_65 = arith.constant 0 : index
    %c0_66 = arith.constant 0 : index
    %145 = vector.load %arg13[%c0_64, %c0_65, %c0_66] : memref<2x1x128xf32, #tpu.memory_space<vmem>>, vector<1x1x128xf32>
    %146 = vector.shape_cast %145 : vector<1x1x128xf32> to vector<1x128xf32>
    %147 = vector.broadcast %146 : vector<1x128xf32> to vector<10x128xf32>
    %148 = arith.addf %144, %147 : vector<10x128xf32>
    %cst_67 = arith.constant 5.000000e-01 : f32
    %149 = vector.broadcast %cst_67 : f32 to vector<10x128xf32>
    %150 = arith.mulf %149, %148 : vector<10x128xf32>
    %cst_68 = arith.constant 0.707106769 : f32
    %151 = vector.broadcast %cst_68 : f32 to vector<10x128xf32>
    %152 = arith.mulf %148, %151 : vector<10x128xf32>
    %153 = math.erf %152 : vector<10x128xf32>
    %cst_69 = arith.constant 1.000000e+00 : f32
    %154 = vector.broadcast %cst_69 : f32 to vector<10x128xf32>
    %155 = arith.addf %154, %153 : vector<10x128xf32>
    %156 = arith.mulf %150, %155 : vector<10x128xf32>
    %c0_70 = arith.constant 0 : index
    %c0_71 = arith.constant 0 : index
    %c0_72 = arith.constant 0 : index
    %157 = vector.load %arg14[%c0_70, %c0_71, %c0_72] : memref<2x128x32xf32, #tpu.memory_space<vmem>>, vector<1x128x32xf32>
    %158 = vector.shape_cast %157 : vector<1x128x32xf32> to vector<128x32xf32>
    %cst_73 = arith.constant dense<0.000000e+00> : vector<10x32xf32>
    %159 = tpu.matmul %156, %158, %cst_73 {dimension_numbers = #tpu.dot_dimension_numbers<[1], [0], [0], [1], [0, 0, 1, 1], [], []>} : vector<10x128xf32>, vector<128x32xf32>, vector<10x32xf32> -> vector<10x32xf32>
    %c0_74 = arith.constant 0 : index
    %c0_75 = arith.constant 0 : index
    %c0_76 = arith.constant 0 : index
    %160 = vector.load %arg15[%c0_74, %c0_75, %c0_76] : memref<2x1x32xf32, #tpu.memory_space<vmem>>, vector<1x1x32xf32>
    %161 = vector.shape_cast %160 : vector<1x1x32xf32> to vector<1x32xf32>
    %162 = vector.broadcast %161 : vector<1x32xf32> to vector<10x32xf32>
    %163 = arith.addf %159, %162 : vector<10x32xf32>
    %164 = arith.addf %115, %163 : vector<10x32xf32>
    %c1 = arith.constant 1 : index
    %c0_77 = arith.constant 0 : index
    %c0_78 = arith.constant 0 : index
    %165 = vector.load %arg5[%c1, %c0_77, %c0_78] : memref<2x1x32xf32, #tpu.memory_space<vmem>>, vector<1x1x32xf32>
    %166 = vector.shape_cast %165 : vector<1x1x32xf32> to vector<1x32xf32>
    %c1_79 = arith.constant 1 : index
    %c0_80 = arith.constant 0 : index
    %c0_81 = arith.constant 0 : index
    %167 = vector.load %arg6[%c1_79, %c0_80, %c0_81] : memref<2x1x32xf32, #tpu.memory_space<vmem>>, vector<1x1x32xf32>
    %168 = vector.shape_cast %167 : vector<1x1x32xf32> to vector<1x32xf32>
    %cst_82 = arith.constant dense<0.000000e+00> : vector<10xf32>
    %169 = vector.multi_reduction <add>, %164, %cst_82 [1] : vector<10x32xf32> to vector<10xf32>
    %170 = vector.shape_cast %169 : vector<10xf32> to vector<10x1xf32>
    %cst_83 = arith.constant 3.200000e+01 : f32
    %171 = vector.broadcast %cst_83 : f32 to vector<10x1xf32>
    %172 = arith.divf %170, %171 : vector<10x1xf32>
    %173 = vector.broadcast %172 : vector<10x1xf32> to vector<10x32xf32>
    %174 = arith.subf %164, %173 : vector<10x32xf32>
    %175 = arith.mulf %174, %174 : vector<10x32xf32>
    %cst_84 = arith.constant dense<0.000000e+00> : vector<10xf32>
    %176 = vector.multi_reduction <add>, %175, %cst_84 [1] : vector<10x32xf32> to vector<10xf32>
    %177 = vector.shape_cast %176 : vector<10xf32> to vector<10x1xf32>
    %cst_85 = arith.constant 3.200000e+01 : f32
    %178 = vector.broadcast %cst_85 : f32 to vector<10x1xf32>
    %179 = arith.divf %177, %178 : vector<10x1xf32>
    %180 = vector.broadcast %172 : vector<10x1xf32> to vector<10x32xf32>
    %181 = arith.subf %164, %180 : vector<10x32xf32>
    %cst_86 = arith.constant 9.99999974E-6 : f32
    %182 = vector.broadcast %cst_86 : f32 to vector<10x1xf32>
    %183 = arith.addf %179, %182 : vector<10x1xf32>
    %184 = math.sqrt %183 : vector<10x1xf32>
    %185 = vector.broadcast %184 : vector<10x1xf32> to vector<10x32xf32>
    %186 = arith.divf %181, %185 : vector<10x32xf32>
    %187 = vector.broadcast %166 : vector<1x32xf32> to vector<10x32xf32>
    %188 = arith.mulf %186, %187 : vector<10x32xf32>
    %189 = vector.broadcast %168 : vector<1x32xf32> to vector<10x32xf32>
    %190 = arith.addf %188, %189 : vector<10x32xf32>
    %c1_87 = arith.constant 1 : index
    %c0_88 = arith.constant 0 : index
    %c0_89 = arith.constant 0 : index
    %191 = vector.load %arg7[%c1_87, %c0_88, %c0_89] : memref<2x32x96xf32, #tpu.memory_space<vmem>>, vector<1x32x96xf32>
    %192 = vector.shape_cast %191 : vector<1x32x96xf32> to vector<32x96xf32>
    %cst_90 = arith.constant dense<0.000000e+00> : vector<10x96xf32>
    %193 = tpu.matmul %190, %192, %cst_90 {dimension_numbers = #tpu.dot_dimension_numbers<[1], [0], [0], [1], [0, 0, 1, 1], [], []>} : vector<10x32xf32>, vector<32x96xf32>, vector<10x96xf32> -> vector<10x96xf32>
    %194 = vector.extract_strided_slice %193 {offsets = [0, 0], sizes = [10, 8], strides = [1, 1]} : vector<10x96xf32> to vector<10x8xf32>
    %195 = vector.extract_strided_slice %193 {offsets = [0, 32], sizes = [10, 8], strides = [1, 1]} : vector<10x96xf32> to vector<10x8xf32>
    %196 = vector.extract_strided_slice %193 {offsets = [0, 64], sizes = [10, 8], strides = [1, 1]} : vector<10x96xf32> to vector<10x8xf32>
    %cst_91 = arith.constant dense<0.000000e+00> : vector<10x10xf32>
    %197 = tpu.matmul %194, %195, %cst_91 {dimension_numbers = #tpu.dot_dimension_numbers<[1], [1], [0], [0], [0, 0, 1, 0], [], []>} : vector<10x8xf32>, vector<10x8xf32>, vector<10x10xf32> -> vector<10x10xf32>
    %cst_92 = arith.constant 0.353553385 : f32
    %198 = vector.broadcast %cst_92 : f32 to vector<10x10xf32>
    %199 = arith.mulf %197, %198 : vector<10x10xf32>
    %200 = arith.addf %199, %5 : vector<10x10xf32>
    %cst_93 = arith.constant dense<0xFF800000> : vector<10xf32>
    %201 = vector.multi_reduction <maximumf>, %200, %cst_93 [1] : vector<10x10xf32> to vector<10xf32>
    %202 = vector.shape_cast %201 : vector<10xf32> to vector<10x1xf32>
    %203 = vector.broadcast %202 : vector<10x1xf32> to vector<10x10xf32>
    %204 = arith.subf %200, %203 : vector<10x10xf32>
    %205 = math.exp %204 : vector<10x10xf32>
    %cst_94 = arith.constant dense<0.000000e+00> : vector<10xf32>
    %206 = vector.multi_reduction <add>, %205, %cst_94 [1] : vector<10x10xf32> to vector<10xf32>
    %207 = vector.shape_cast %206 : vector<10xf32> to vector<10x1xf32>
    %208 = tpu.reciprocal %207 {approx = true} : vector<10x1xf32> -> vector<10x1xf32>
    %209 = vector.broadcast %208 : vector<10x1xf32> to vector<10x10xf32>
    %210 = arith.mulf %205, %209 : vector<10x10xf32>
    %cst_95 = arith.constant dense<0.000000e+00> : vector<10x8xf32>
    %211 = tpu.matmul %210, %196, %cst_95 {dimension_numbers = #tpu.dot_dimension_numbers<[1], [0], [0], [1], [0, 0, 1, 1], [], []>} : vector<10x10xf32>, vector<10x8xf32>, vector<10x8xf32> -> vector<10x8xf32>
    %212 = vector.extract_strided_slice %193 {offsets = [0, 8], sizes = [10, 8], strides = [1, 1]} : vector<10x96xf32> to vector<10x8xf32>
    %213 = vector.extract_strided_slice %193 {offsets = [0, 40], sizes = [10, 8], strides = [1, 1]} : vector<10x96xf32> to vector<10x8xf32>
    %214 = vector.extract_strided_slice %193 {offsets = [0, 72], sizes = [10, 8], strides = [1, 1]} : vector<10x96xf32> to vector<10x8xf32>
    %cst_96 = arith.constant dense<0.000000e+00> : vector<10x10xf32>
    %215 = tpu.matmul %212, %213, %cst_96 {dimension_numbers = #tpu.dot_dimension_numbers<[1], [1], [0], [0], [0, 0, 1, 0], [], []>} : vector<10x8xf32>, vector<10x8xf32>, vector<10x10xf32> -> vector<10x10xf32>
    %cst_97 = arith.constant 0.353553385 : f32
    %216 = vector.broadcast %cst_97 : f32 to vector<10x10xf32>
    %217 = arith.mulf %215, %216 : vector<10x10xf32>
    %218 = arith.addf %217, %5 : vector<10x10xf32>
    %cst_98 = arith.constant dense<0xFF800000> : vector<10xf32>
    %219 = vector.multi_reduction <maximumf>, %218, %cst_98 [1] : vector<10x10xf32> to vector<10xf32>
    %220 = vector.shape_cast %219 : vector<10xf32> to vector<10x1xf32>
    %221 = vector.broadcast %220 : vector<10x1xf32> to vector<10x10xf32>
    %222 = arith.subf %218, %221 : vector<10x10xf32>
    %223 = math.exp %222 : vector<10x10xf32>
    %cst_99 = arith.constant dense<0.000000e+00> : vector<10xf32>
    %224 = vector.multi_reduction <add>, %223, %cst_99 [1] : vector<10x10xf32> to vector<10xf32>
    %225 = vector.shape_cast %224 : vector<10xf32> to vector<10x1xf32>
    %226 = tpu.reciprocal %225 {approx = true} : vector<10x1xf32> -> vector<10x1xf32>
    %227 = vector.broadcast %226 : vector<10x1xf32> to vector<10x10xf32>
    %228 = arith.mulf %223, %227 : vector<10x10xf32>
    %cst_100 = arith.constant dense<0.000000e+00> : vector<10x8xf32>
    %229 = tpu.matmul %228, %214, %cst_100 {dimension_numbers = #tpu.dot_dimension_numbers<[1], [0], [0], [1], [0, 0, 1, 1], [], []>} : vector<10x10xf32>, vector<10x8xf32>, vector<10x8xf32> -> vector<10x8xf32>
    %230 = vector.extract_strided_slice %193 {offsets = [0, 16], sizes = [10, 8], strides = [1, 1]} : vector<10x96xf32> to vector<10x8xf32>
    %231 = vector.extract_strided_slice %193 {offsets = [0, 48], sizes = [10, 8], strides = [1, 1]} : vector<10x96xf32> to vector<10x8xf32>
    %232 = vector.extract_strided_slice %193 {offsets = [0, 80], sizes = [10, 8], strides = [1, 1]} : vector<10x96xf32> to vector<10x8xf32>
    %cst_101 = arith.constant dense<0.000000e+00> : vector<10x10xf32>
    %233 = tpu.matmul %230, %231, %cst_101 {dimension_numbers = #tpu.dot_dimension_numbers<[1], [1], [0], [0], [0, 0, 1, 0], [], []>} : vector<10x8xf32>, vector<10x8xf32>, vector<10x10xf32> -> vector<10x10xf32>
    %cst_102 = arith.constant 0.353553385 : f32
    %234 = vector.broadcast %cst_102 : f32 to vector<10x10xf32>
    %235 = arith.mulf %233, %234 : vector<10x10xf32>
    %236 = arith.addf %235, %5 : vector<10x10xf32>
    %cst_103 = arith.constant dense<0xFF800000> : vector<10xf32>
    %237 = vector.multi_reduction <maximumf>, %236, %cst_103 [1] : vector<10x10xf32> to vector<10xf32>
    %238 = vector.shape_cast %237 : vector<10xf32> to vector<10x1xf32>
    %239 = vector.broadcast %238 : vector<10x1xf32> to vector<10x10xf32>
    %240 = arith.subf %236, %239 : vector<10x10xf32>
    %241 = math.exp %240 : vector<10x10xf32>
    %cst_104 = arith.constant dense<0.000000e+00> : vector<10xf32>
    %242 = vector.multi_reduction <add>, %241, %cst_104 [1] : vector<10x10xf32> to vector<10xf32>
    %243 = vector.shape_cast %242 : vector<10xf32> to vector<10x1xf32>
    %244 = tpu.reciprocal %243 {approx = true} : vector<10x1xf32> -> vector<10x1xf32>
    %245 = vector.broadcast %244 : vector<10x1xf32> to vector<10x10xf32>
    %246 = arith.mulf %241, %245 : vector<10x10xf32>
    %cst_105 = arith.constant dense<0.000000e+00> : vector<10x8xf32>
    %247 = tpu.matmul %246, %232, %cst_105 {dimension_numbers = #tpu.dot_dimension_numbers<[1], [0], [0], [1], [0, 0, 1, 1], [], []>} : vector<10x10xf32>, vector<10x8xf32>, vector<10x8xf32> -> vector<10x8xf32>
    %248 = vector.extract_strided_slice %193 {offsets = [0, 24], sizes = [10, 8], strides = [1, 1]} : vector<10x96xf32> to vector<10x8xf32>
    %249 = vector.extract_strided_slice %193 {offsets = [0, 56], sizes = [10, 8], strides = [1, 1]} : vector<10x96xf32> to vector<10x8xf32>
    %250 = vector.extract_strided_slice %193 {offsets = [0, 88], sizes = [10, 8], strides = [1, 1]} : vector<10x96xf32> to vector<10x8xf32>
    %cst_106 = arith.constant dense<0.000000e+00> : vector<10x10xf32>
    %251 = tpu.matmul %248, %249, %cst_106 {dimension_numbers = #tpu.dot_dimension_numbers<[1], [1], [0], [0], [0, 0, 1, 0], [], []>} : vector<10x8xf32>, vector<10x8xf32>, vector<10x10xf32> -> vector<10x10xf32>
    %cst_107 = arith.constant 0.353553385 : f32
    %252 = vector.broadcast %cst_107 : f32 to vector<10x10xf32>
    %253 = arith.mulf %251, %252 : vector<10x10xf32>
    %254 = arith.addf %253, %5 : vector<10x10xf32>
    %cst_108 = arith.constant dense<0xFF800000> : vector<10xf32>
    %255 = vector.multi_reduction <maximumf>, %254, %cst_108 [1] : vector<10x10xf32> to vector<10xf32>
    %256 = vector.shape_cast %255 : vector<10xf32> to vector<10x1xf32>
    %257 = vector.broadcast %256 : vector<10x1xf32> to vector<10x10xf32>
    %258 = arith.subf %254, %257 : vector<10x10xf32>
    %259 = math.exp %258 : vector<10x10xf32>
    %cst_109 = arith.constant dense<0.000000e+00> : vector<10xf32>
    %260 = vector.multi_reduction <add>, %259, %cst_109 [1] : vector<10x10xf32> to vector<10xf32>
    %261 = vector.shape_cast %260 : vector<10xf32> to vector<10x1xf32>
    %262 = tpu.reciprocal %261 {approx = true} : vector<10x1xf32> -> vector<10x1xf32>
    %263 = vector.broadcast %262 : vector<10x1xf32> to vector<10x10xf32>
    %264 = arith.mulf %259, %263 : vector<10x10xf32>
    %cst_110 = arith.constant dense<0.000000e+00> : vector<10x8xf32>
    %265 = tpu.matmul %264, %250, %cst_110 {dimension_numbers = #tpu.dot_dimension_numbers<[1], [0], [0], [1], [0, 0, 1, 1], [], []>} : vector<10x10xf32>, vector<10x8xf32>, vector<10x8xf32> -> vector<10x8xf32>
    %266 = tpu.concatenate %211, %229, %247, %265 in 1 : vector<10x8xf32>, vector<10x8xf32>, vector<10x8xf32>, vector<10x8xf32> -> vector<10x32xf32>
    %c1_111 = arith.constant 1 : index
    %c0_112 = arith.constant 0 : index
    %c0_113 = arith.constant 0 : index
    %267 = vector.load %arg8[%c1_111, %c0_112, %c0_113] : memref<2x32x32xf32, #tpu.memory_space<vmem>>, vector<1x32x32xf32>
    %268 = vector.shape_cast %267 : vector<1x32x32xf32> to vector<32x32xf32>
    %cst_114 = arith.constant dense<0.000000e+00> : vector<10x32xf32>
    %269 = tpu.matmul %266, %268, %cst_114 {dimension_numbers = #tpu.dot_dimension_numbers<[1], [0], [0], [1], [0, 0, 1, 1], [], []>} : vector<10x32xf32>, vector<32x32xf32>, vector<10x32xf32> -> vector<10x32xf32>
    %c1_115 = arith.constant 1 : index
    %c0_116 = arith.constant 0 : index
    %c0_117 = arith.constant 0 : index
    %270 = vector.load %arg9[%c1_115, %c0_116, %c0_117] : memref<2x1x32xf32, #tpu.memory_space<vmem>>, vector<1x1x32xf32>
    %271 = vector.shape_cast %270 : vector<1x1x32xf32> to vector<1x32xf32>
    %272 = vector.broadcast %271 : vector<1x32xf32> to vector<10x32xf32>
    %273 = arith.addf %269, %272 : vector<10x32xf32>
    %274 = arith.addf %164, %273 : vector<10x32xf32>
    %c1_118 = arith.constant 1 : index
    %c0_119 = arith.constant 0 : index
    %c0_120 = arith.constant 0 : index
    %275 = vector.load %arg10[%c1_118, %c0_119, %c0_120] : memref<2x1x32xf32, #tpu.memory_space<vmem>>, vector<1x1x32xf32>
    %276 = vector.shape_cast %275 : vector<1x1x32xf32> to vector<1x32xf32>
    %c1_121 = arith.constant 1 : index
    %c0_122 = arith.constant 0 : index
    %c0_123 = arith.constant 0 : index
    %277 = vector.load %arg11[%c1_121, %c0_122, %c0_123] : memref<2x1x32xf32, #tpu.memory_space<vmem>>, vector<1x1x32xf32>
    %278 = vector.shape_cast %277 : vector<1x1x32xf32> to vector<1x32xf32>
    %cst_124 = arith.constant dense<0.000000e+00> : vector<10xf32>
    %279 = vector.multi_reduction <add>, %274, %cst_124 [1] : vector<10x32xf32> to vector<10xf32>
    %280 = vector.shape_cast %279 : vector<10xf32> to vector<10x1xf32>
    %cst_125 = arith.constant 3.200000e+01 : f32
    %281 = vector.broadcast %cst_125 : f32 to vector<10x1xf32>
    %282 = arith.divf %280, %281 : vector<10x1xf32>
    %283 = vector.broadcast %282 : vector<10x1xf32> to vector<10x32xf32>
    %284 = arith.subf %274, %283 : vector<10x32xf32>
    %285 = arith.mulf %284, %284 : vector<10x32xf32>
    %cst_126 = arith.constant dense<0.000000e+00> : vector<10xf32>
    %286 = vector.multi_reduction <add>, %285, %cst_126 [1] : vector<10x32xf32> to vector<10xf32>
    %287 = vector.shape_cast %286 : vector<10xf32> to vector<10x1xf32>
    %cst_127 = arith.constant 3.200000e+01 : f32
    %288 = vector.broadcast %cst_127 : f32 to vector<10x1xf32>
    %289 = arith.divf %287, %288 : vector<10x1xf32>
    %290 = vector.broadcast %282 : vector<10x1xf32> to vector<10x32xf32>
    %291 = arith.subf %274, %290 : vector<10x32xf32>
    %cst_128 = arith.constant 9.99999974E-6 : f32
    %292 = vector.broadcast %cst_128 : f32 to vector<10x1xf32>
    %293 = arith.addf %289, %292 : vector<10x1xf32>
    %294 = math.sqrt %293 : vector<10x1xf32>
    %295 = vector.broadcast %294 : vector<10x1xf32> to vector<10x32xf32>
    %296 = arith.divf %291, %295 : vector<10x32xf32>
    %297 = vector.broadcast %276 : vector<1x32xf32> to vector<10x32xf32>
    %298 = arith.mulf %296, %297 : vector<10x32xf32>
    %299 = vector.broadcast %278 : vector<1x32xf32> to vector<10x32xf32>
    %300 = arith.addf %298, %299 : vector<10x32xf32>
    %c1_129 = arith.constant 1 : index
    %c0_130 = arith.constant 0 : index
    %c0_131 = arith.constant 0 : index
    %301 = vector.load %arg12[%c1_129, %c0_130, %c0_131] : memref<2x32x128xf32, #tpu.memory_space<vmem>>, vector<1x32x128xf32>
    %302 = vector.shape_cast %301 : vector<1x32x128xf32> to vector<32x128xf32>
    %cst_132 = arith.constant dense<0.000000e+00> : vector<10x128xf32>
    %303 = tpu.matmul %300, %302, %cst_132 {dimension_numbers = #tpu.dot_dimension_numbers<[1], [0], [0], [1], [0, 0, 1, 1], [], []>} : vector<10x32xf32>, vector<32x128xf32>, vector<10x128xf32> -> vector<10x128xf32>
    %c1_133 = arith.constant 1 : index
    %c0_134 = arith.constant 0 : index
    %c0_135 = arith.constant 0 : index
    %304 = vector.load %arg13[%c1_133, %c0_134, %c0_135] : memref<2x1x128xf32, #tpu.memory_space<vmem>>, vector<1x1x128xf32>
    %305 = vector.shape_cast %304 : vector<1x1x128xf32> to vector<1x128xf32>
    %306 = vector.broadcast %305 : vector<1x128xf32> to vector<10x128xf32>
    %307 = arith.addf %303, %306 : vector<10x128xf32>
    %cst_136 = arith.constant 5.000000e-01 : f32
    %308 = vector.broadcast %cst_136 : f32 to vector<10x128xf32>
    %309 = arith.mulf %308, %307 : vector<10x128xf32>
    %cst_137 = arith.constant 0.707106769 : f32
    %310 = vector.broadcast %cst_137 : f32 to vector<10x128xf32>
    %311 = arith.mulf %307, %310 : vector<10x128xf32>
    %312 = math.erf %311 : vector<10x128xf32>
    %cst_138 = arith.constant 1.000000e+00 : f32
    %313 = vector.broadcast %cst_138 : f32 to vector<10x128xf32>
    %314 = arith.addf %313, %312 : vector<10x128xf32>
    %315 = arith.mulf %309, %314 : vector<10x128xf32>
    %c1_139 = arith.constant 1 : index
    %c0_140 = arith.constant 0 : index
    %c0_141 = arith.constant 0 : index
    %316 = vector.load %arg14[%c1_139, %c0_140, %c0_141] : memref<2x128x32xf32, #tpu.memory_space<vmem>>, vector<1x128x32xf32>
    %317 = vector.shape_cast %316 : vector<1x128x32xf32> to vector<128x32xf32>
    %cst_142 = arith.constant dense<0.000000e+00> : vector<10x32xf32>
    %318 = tpu.matmul %315, %317, %cst_142 {dimension_numbers = #tpu.dot_dimension_numbers<[1], [0], [0], [1], [0, 0, 1, 1], [], []>} : vector<10x128xf32>, vector<128x32xf32>, vector<10x32xf32> -> vector<10x32xf32>
    %c1_143 = arith.constant 1 : index
    %c0_144 = arith.constant 0 : index
    %c0_145 = arith.constant 0 : index
    %319 = vector.load %arg15[%c1_143, %c0_144, %c0_145] : memref<2x1x32xf32, #tpu.memory_space<vmem>>, vector<1x1x32xf32>
    %320 = vector.shape_cast %319 : vector<1x1x32xf32> to vector<1x32xf32>
    %321 = vector.broadcast %320 : vector<1x32xf32> to vector<10x32xf32>
    %322 = arith.addf %318, %321 : vector<10x32xf32>
    %323 = arith.addf %274, %322 : vector<10x32xf32>
    %c0_146 = arith.constant 0 : index
    %c0_147 = arith.constant 0 : index
    %324 = vector.load %arg4[%c0_146, %c0_147] : memref<2x10xf32, #tpu.memory_space<vmem>>, vector<2x10xf32>
    %cst_148 = arith.constant dense<0.000000e+00> : vector<2x32xf32>
    %325 = tpu.matmul %324, %323, %cst_148 {dimension_numbers = #tpu.dot_dimension_numbers<[1], [0], [0], [1], [0, 0, 1, 1], [], []>} : vector<2x10xf32>, vector<10x32xf32>, vector<2x32xf32> -> vector<2x32xf32>
    %c0_149 = arith.constant 0 : index
    %c0_150 = arith.constant 0 : index
    %326 = vector.load %arg16[%c0_149, %c0_150] : memref<1x32xf32, #tpu.memory_space<vmem>>, vector<1x32xf32>
    %c0_151 = arith.constant 0 : index
    %c0_152 = arith.constant 0 : index
    %327 = vector.load %arg17[%c0_151, %c0_152] : memref<1x32xf32, #tpu.memory_space<vmem>>, vector<1x32xf32>
    %cst_153 = arith.constant dense<0.000000e+00> : vector<2xf32>
    %328 = vector.multi_reduction <add>, %325, %cst_153 [1] : vector<2x32xf32> to vector<2xf32>
    %329 = vector.shape_cast %328 : vector<2xf32> to vector<2x1xf32>
    %cst_154 = arith.constant 3.200000e+01 : f32
    %330 = vector.broadcast %cst_154 : f32 to vector<2x1xf32>
    %331 = arith.divf %329, %330 : vector<2x1xf32>
    %332 = vector.broadcast %331 : vector<2x1xf32> to vector<2x32xf32>
    %333 = arith.subf %325, %332 : vector<2x32xf32>
    %334 = arith.mulf %333, %333 : vector<2x32xf32>
    %cst_155 = arith.constant dense<0.000000e+00> : vector<2xf32>
    %335 = vector.multi_reduction <add>, %334, %cst_155 [1] : vector<2x32xf32> to vector<2xf32>
    %336 = vector.shape_cast %335 : vector<2xf32> to vector<2x1xf32>
    %cst_156 = arith.constant 3.200000e+01 : f32
    %337 = vector.broadcast %cst_156 : f32 to vector<2x1xf32>
    %338 = arith.divf %336, %337 : vector<2x1xf32>
    %339 = vector.broadcast %331 : vector<2x1xf32> to vector<2x32xf32>
    %340 = arith.subf %325, %339 : vector<2x32xf32>
    %cst_157 = arith.constant 9.99999974E-6 : f32
    %341 = vector.broadcast %cst_157 : f32 to vector<2x1xf32>
    %342 = arith.addf %338, %341 : vector<2x1xf32>
    %343 = math.sqrt %342 : vector<2x1xf32>
    %344 = vector.broadcast %343 : vector<2x1xf32> to vector<2x32xf32>
    %345 = arith.divf %340, %344 : vector<2x32xf32>
    %346 = vector.broadcast %326 : vector<1x32xf32> to vector<2x32xf32>
    %347 = arith.mulf %345, %346 : vector<2x32xf32>
    %348 = vector.broadcast %327 : vector<1x32xf32> to vector<2x32xf32>
    %349 = arith.addf %347, %348 : vector<2x32xf32>
    %c0_158 = arith.constant 0 : index
    %c0_159 = arith.constant 0 : index
    %350 = vector.load %arg18[%c0_158, %c0_159] : memref<2x32xf32, #tpu.memory_space<vmem>>, vector<2x32xf32>
    tpu.vector_store %arg18[%c0_158, %c0_159], %349 {strides = array<i32>} : memref<2x32xf32, #tpu.memory_space<vmem>>, vector<2x32xf32>,
    return
  }
}

</mosaic_0001>

<bundles_post_ra>
// kernel: custom-call.2
= control target key start
LH: loop header
LB: loop body
LE: loop exit
PB: predicated region body
PF: predicated region fallthrough
CT: control target
= control target key end

     0   :  { %s6_s0 = inlined_call_operand.vmem [shape: u32[2,4], index: 0, kind: output, shape index: {}]  }

// kernel: squeeze.5
= control target key start
LH: loop header
LB: loop body
LE: loop exit
PB: predicated region body
PF: predicated region fallthrough
CT: control target
= control target key end

     0   :  { %vm3_vm0 = vcmask 64512   ;;  %s321_s12 = smov 120   ;;  %s456_s0 = inlined_call_operand.vmem [shape: f32[2,1,16,16], index: 0, kind: input, shape index: {}]   ;;  %s457_s1 = inlined_call_operand.vmem [shape: f32[2,2,8,2,8], index: 1, kind: output, shape index: {}]  }
   0x1   :  { %v287_v0 = vld [vmem:[%s456_s0 + $0x10] sm:$0xff]   ;;  %v27_v1 = vld [vmem:[%s456_s0] sm:$0xff]   ;;  %v288_v2 = vld [vmem:[%s456_s0 + $0x18] sm:$0xff]  }
   0x2   :  { %46 = vrot.lane.b32.xlu1 %v287_v0, %s321_s12  ;;  %28 = vrot.lane.b32.xlu0 %v27_v1, %s321_s12  ;;  %v286_v3 = vld [vmem:[%s456_s0 + $0x8] sm:$0xff]   ;;  %17 = vst.msk [vmem:[#allocation0 + $0x80] ss:$8 sm:$0xf] %vm3_vm0, %v287_v0  }
   0x3   :  { %19 = vst.msk [vmem:[#allocation0 + $0x80] ss:$8 sm:$0xf0] %vm3_vm0, %v287_v0   ;;  %4 = vst.msk [vmem:[#allocation0] ss:$8 sm:$0xf] %vm3_vm0, %v27_v1  }
   0x4   :  { %5 = vst.msk [vmem:[#allocation0] ss:$8 sm:$0xf0] %vm3_vm0, %v27_v1   ;;  %24 = vst.msk [vmem:[#allocation0 + $0xc0] ss:$8 sm:$0xf] %vm3_vm0, %v288_v2  }
   0x5   :  { %26 = vst.msk [vmem:[#allocation0 + $0xc0] ss:$8 sm:$0xf0] %vm3_vm0, %v288_v2   ;;  %10 = vst.msk [vmem:[#allocation0 + $0x40] ss:$8 sm:$0xf] %vm3_vm0, %v286_v3  }
   0x6   :  { %12 = vst.msk [vmem:[#allocation0 + $0x40] ss:$8 sm:$0xf0] %vm3_vm0, %v286_v3   ;;  %55 = vrot.lane.b32.xlu1 %v288_v2, %s321_s12  ;;  %37 = vrot.lane.b32.xlu0 %v286_v3, %s321_s12 }
  0x74   :  { %v47_v4 = vpop.permute.xlu1 %46   ;;  %v29_v5 = vpop.permute.xlu0 %28  }
  0x75   :  { %50 = vst.msk [vmem:[#allocation0 + $0x81] ss:$8 sm:$0xf] %vm3_vm0, %v47_v4   ;;  %52 = vst.msk [vmem:[#allocation0 + $0x81] ss:$8 sm:$0xf0] %vm3_vm0, %v47_v4  }
  0x76   :  { %32 = vst.msk [vmem:[#allocation0 + $0x1] ss:$8 sm:$0xf] %vm3_vm0, %v29_v5   ;;  %34 = vst.msk [vmem:[#allocation0 + $0x1] ss:$8 sm:$0xf0] %vm3_vm0, %v29_v5  }
  0x78   :  { %v56_v6 = vpop.permute.xlu1 %55   ;;  %v38_v7 = vpop.permute.xlu0 %37  }
  0x79   :  { %59 = vst.msk [vmem:[#allocation0 + $0xc1] ss:$8 sm:$0xf] %vm3_vm0, %v56_v6   ;;  %61 = vst.msk [vmem:[#allocation0 + $0xc1] ss:$8 sm:$0xf0] %vm3_vm0, %v56_v6  }
  0x7a   :  { %41 = vst.msk [vmem:[#allocation0 + $0x41] ss:$8 sm:$0xf] %vm3_vm0, %v38_v7   ;;  %43 = vst.msk [vmem:[#allocation0 + $0x41] ss:$8 sm:$0xf0] %vm3_vm0, %v38_v7  }
  0x7c   :  { %v158_v8 = vld [vmem:[#allocation0 + $0x80] sm:$0x3]  ;;  %v164_v9 = vld [vmem:[#allocation0 + $0x88] sm:$0x3]  ;;  %v170_v10 = vld [vmem:[#allocation0 + $0x90] sm:$0x3] }
  0x7d   :  { %304 = vst [vmem:[%s457_s1 + $0x20] sm:$0x3] %v158_v8  ;;  %305 = vst [vmem:[%s457_s1 + $0x22] sm:$0x3] %v164_v9  ;;  %v176_v11 = vld [vmem:[#allocation0 + $0x98] sm:$0x3] }
  0x7e   :  { %306 = vst [vmem:[%s457_s1 + $0x24] sm:$0x3] %v170_v10  ;;  %v182_v12 = vld [vmem:[#allocation0 + $0xa0] sm:$0x3]  ;;  %v188_v13 = vld [vmem:[#allocation0 + $0xa8] sm:$0x3] }
  0x7f   :  { %307 = vst [vmem:[%s457_s1 + $0x26] sm:$0x3] %v176_v11  ;;  %308 = vst [vmem:[%s457_s1 + $0x28] sm:$0x3] %v182_v12  ;;  %v194_v14 = vld [vmem:[#allocation0 + $0xb0] sm:$0x3] }
  0x80   :  { %309 = vst [vmem:[%s457_s1 + $0x2a] sm:$0x3] %v188_v13  ;;  %v200_v15 = vld [vmem:[#allocation0 + $0xb8] sm:$0x3]  ;;  %v65_v16 = vld [vmem:[#allocation0] sm:$0x3] }
  0x81   :  { %310 = vst [vmem:[%s457_s1 + $0x2c] sm:$0x3] %v194_v14  ;;  %311 = vst [vmem:[%s457_s1 + $0x2e] sm:$0x3] %v200_v15  ;;  %v69_v17 = vld [vmem:[#allocation0 + $0x8] sm:$0x3] }
  0x82   :  { %67 = vst [vmem:[%s457_s1] sm:$0x3] %v65_v16  ;;  %v74_v18 = vld [vmem:[#allocation0 + $0x10] sm:$0x3]  ;;  %v80_v19 = vld [vmem:[#allocation0 + $0x18] sm:$0x3] }
  0x83   :  { %289 = vst [vmem:[%s457_s1 + $0x2] sm:$0x3] %v69_v17  ;;  %290 = vst [vmem:[%s457_s1 + $0x4] sm:$0x3] %v74_v18  ;;  %v86_v20 = vld [vmem:[#allocation0 + $0x20] sm:$0x3] }
  0x84   :  { %291 = vst [vmem:[%s457_s1 + $0x6] sm:$0x3] %v80_v19  ;;  %v92_v21 = vld [vmem:[#allocation0 + $0x28] sm:$0x3]  ;;  %v98_v22 = vld [vmem:[#allocation0 + $0x30] sm:$0x3] }
  0x85   :  { %292 = vst [vmem:[%s457_s1 + $0x8] sm:$0x3] %v86_v20  ;;  %293 = vst [vmem:[%s457_s1 + $0xa] sm:$0x3] %v92_v21  ;;  %v104_v23 = vld [vmem:[#allocation0 + $0x38] sm:$0x3] }
  0x86   :  { %294 = vst [vmem:[%s457_s1 + $0xc] sm:$0x3] %v98_v22  ;;  %v206_v24 = vld [vmem:[#allocation0 + $0xc0] sm:$0x3]  ;;  %v212_v25 = vld [vmem:[#allocation0 + $0xc8] sm:$0x3] }
  0x87   :  { %295 = vst [vmem:[%s457_s1 + $0xe] sm:$0x3] %v104_v23  ;;  %312 = vst [vmem:[%s457_s1 + $0x30] sm:$0x3] %v206_v24  ;;  %v218_v26 = vld [vmem:[#allocation0 + $0xd0] sm:$0x3] }
  0x88   :  { %313 = vst [vmem:[%s457_s1 + $0x32] sm:$0x3] %v212_v25  ;;  %v224_v27 = vld [vmem:[#allocation0 + $0xd8] sm:$0x3]  ;;  %v230_v28 = vld [vmem:[#allocation0 + $0xe0] sm:$0x3] }
  0x89   :  { %314 = vst [vmem:[%s457_s1 + $0x34] sm:$0x3] %v218_v26  ;;  %315 = vst [vmem:[%s457_s1 + $0x36] sm:$0x3] %v224_v27  ;;  %v236_v29 = vld [vmem:[#allocation0 + $0xe8] sm:$0x3] }
  0x8a   :  { %316 = vst [vmem:[%s457_s1 + $0x38] sm:$0x3] %v230_v28  ;;  %v242_v30 = vld [vmem:[#allocation0 + $0xf0] sm:$0x3]  ;;  %v248_v31 = vld [vmem:[#allocation0 + $0xf8] sm:$0x3] }
  0x8b   :  { %317 = vst [vmem:[%s457_s1 + $0x3a] sm:$0x3] %v236_v29  ;;  %318 = vst [vmem:[%s457_s1 + $0x3c] sm:$0x3] %v242_v30  ;;  %v110_v32 = vld [vmem:[#allocation0 + $0x40] sm:$0x3] }
  0x8c   :  { %319 = vst [vmem:[%s457_s1 + $0x3e] sm:$0x3] %v248_v31  ;;  %v116_v33 = vld [vmem:[#allocation0 + $0x48] sm:$0x3]  ;;  %v122_v34 = vld [vmem:[#allocation0 + $0x50] sm:$0x3] }
  0x8d   :  { %296 = vst [vmem:[%s457_s1 + $0x10] sm:$0x3] %v110_v32  ;;  %297 = vst [vmem:[%s457_s1 + $0x12] sm:$0x3] %v116_v33  ;;  %v128_v35 = vld [vmem:[#allocation0 + $0x58] sm:$0x3] }
  0x8e   :  { %298 = vst [vmem:[%s457_s1 + $0x14] sm:$0x3] %v122_v34  ;;  %v134_v36 = vld [vmem:[#allocation0 + $0x60] sm:$0x3]  ;;  %v140_v37 = vld [vmem:[#allocation0 + $0x68] sm:$0x3] }
  0x8f   :  { %299 = vst [vmem:[%s457_s1 + $0x16] sm:$0x3] %v128_v35  ;;  %300 = vst [vmem:[%s457_s1 + $0x18] sm:$0x3] %v134_v36  ;;  %v146_v38 = vld [vmem:[#allocation0 + $0x70] sm:$0x3] }
  0x90   :  { %301 = vst [vmem:[%s457_s1 + $0x1a] sm:$0x3] %v140_v37  ;;  %v152_v39 = vld [vmem:[#allocation0 + $0x78] sm:$0x3]  ;;  %302 = vst [vmem:[%s457_s1 + $0x1c] sm:$0x3] %v146_v38 }
  0x91   :  { %303 = vst [vmem:[%s457_s1 + $0x1e] sm:$0x3] %v152_v39 }

// kernel: ne.8
= control target key start
LH: loop header
LB: loop body
LE: loop exit
PB: predicated region body
PF: predicated region fallthrough
CT: control target
= control target key end

     0   :  { %v15_v2 = vmov 0   ;;  %s40_s0 = inlined_call_operand.vmem [shape: f32[2,4], index: 0, kind: input, shape index: {}, may-alias: {0,1}]   ;;  %s41_s1 = inlined_call_operand.vmem [shape: f32[2,4], index: 1, kind: input, shape index: {}, may-alias: {0,1}]   ;;  %s42_s2 = inlined_call_operand.vmem [shape: pred[2,4], index: 2, kind: output, shape index: {}]  }
   0x1   :  { %v3_v0 = vld [vmem:[%s40_s0] sm:$0x3] }
   0x2   :  { %v4_v1 = vld [vmem:[%s41_s1] sm:$0x3] }
   0x3   :  { %vm7_vm0 = vcmp.ne.f32.partialorder %v3_v0, %v4_v1 }
   0x4   :  { %v8_v3 = vsel %vm7_vm0, 1, %v15_v2 }
   0x5   :  { %v10_v4 = vpack.c.b16 %v15_v2, %v8_v3 }
   0x7   :  { %v11_v5 = vpack.c.b8 %v15_v2, %v10_v4 }
   0x9   :  { %13 = vst [vmem:[%s42_s2] sm:$0x1] %v11_v5 }

// kernel: squeeze.12
= control target key start
LH: loop header
LB: loop body
LE: loop exit
PB: predicated region body
PF: predicated region fallthrough
CT: control target
= control target key end

     0   :  { %vm7_vm0 = vcmask 31744   ;;  %s39_s0 = inlined_call_operand.vmem [shape: f32[8], index: 0, kind: input, shape index: {}]   ;;  %s40_s1 = inlined_call_operand.vmem [shape: f32[2,4], index: 1, kind: output, shape index: {}]  }
   0x1   :  { %v4_v0 = vld [vmem:[%s39_s0] sm:$0x1]  ;;  %s22_s0 = smov 124  }
   0x2   :  { %5 = vst [vmem:[#allocation1] sm:$0x1] %v4_v0 }
   0x9   :  { %v9_v1 = vld [vmem:[#allocation1] sm:$0x1]  }
   0xa   :  { %v6_v2 = vld [vmem:[#allocation1] sm:$0x1]   ;;  %10 = vrot.lane.b32.xlu0 %v9_v1, %s22_s0 }
   0xb   :  { %8 = vst.msk [vmem:[#allocation0] sm:$0x1] %vm7_vm0, %v6_v2  }
  0x7c   :  { %v11_v3 = vpop.permute.xlu0 %10  }
  0x7d   :  { %14 = vst.msk [vmem:[#allocation0 + $0x1] sm:$0x1] %vm7_vm0, %v11_v3  }
  0x84   :  { %v18_v4 = vld [vmem:[#allocation0] sm:$0x3] }
  0x85   :  { %20 = vst [vmem:[%s40_s1] sm:$0x3] %v18_v4 }

// kernel: eq.12
= control target key start
LH: loop header
LB: loop body
LE: loop exit
PB: predicated region body
PF: predicated region fallthrough
CT: control target
= control target key end

     0   :  { %vm7_vm0 = vcmask 39936   ;;  %vm13_vm1 = vcmask 80936   ;;  %s39_s0 = inlined_call_operand.vmem [shape: s32[2,5], index: 0, kind: input, shape index: {}]   ;;  %s40_s1 = inlined_call_operand.vmem [shape: s32[10], index: 1, kind: output, shape index: {}]  }
   0x1   :  { %v4_v0 = vld [vmem:[%s39_s0] sm:$0x3]  ;;  %s22_s0 = smov 5  }
   0x2   :  { %5 = vst [vmem:[#allocation1] sm:$0x3] %v4_v0 }
   0x9   :  { %v10_v1 = vld [vmem:[#allocation1 + $0x1] sm:$0x1]   ;;  %v6_v2 = vld [vmem:[#allocation1] sm:$0x1]  }
   0xa   :  { %11 = vrot.lane.b32.xlu0 %v10_v1, %s22_s0  ;;  %8 = vst.msk [vmem:[#allocation0] sm:$0x1] %vm7_vm0, %v6_v2  }
  0x7c   :  { %v12_v3 = vpop.permute.xlu0 %11  }
  0x7d   :  { %14 = vst.msk [vmem:[#allocation0] sm:$0x1] %vm13_vm1, %v12_v3  }
  0x84   :  { %v18_v4 = vld [vmem:[#allocation0] sm:$0x1] }
  0x85   :  { %20 = vst [vmem:[%s40_s1] sm:$0x1] %v18_v4 }

// kernel: forward.1
= control target key start
LH: loop header
LB: loop body
LE: loop exit
PB: predicated region body
PF: predicated region fallthrough
CT: control target
= control target key end

     0   :  { %s4836_s0 = inlined_call_operand.vmem [shape: f32[10,192], index: 0, kind: input, shape index: {}]   ;;  %s4837_s1 = inlined_call_operand.vmem [shape: f32[192,32], index: 1, kind: input, shape index: {}]   ;;  %s4838_s2 = inlined_call_operand.vmem [shape: f32[10,32], index: 2, kind: input, shape index: {}]   ;;  %s4839_s3 = inlined_call_operand.vmem [shape: f32[10,10], index: 3, kind: input, shape index: {}]   ;;  %s4840_s4 = inlined_call_operand.vmem [shape: f32[2,10], index: 4, kind: input, shape index: {}]   ;;  %s4841_s5 = inlined_call_operand.vmem [shape: f32[2,1,32], index: 5, kind: input, shape index: {}]   ;;  %s4842_s6 = inlined_call_operand.vmem [shape: f32[2,1,32], index: 6, kind: input, shape index: {}]   ;;  %s4843_s7 = inlined_call_operand.vmem [shape: f32[2,32,96], index: 7, kind: input, shape index: {}]   ;;  %s4844_s8 = inlined_call_operand.vmem [shape: f32[2,32,32], index: 8, kind: input, shape index: {}]   ;;  %s4845_s9 = inlined_call_operand.vmem [shape: f32[2,1,32], index: 9, kind: input, shape index: {}]   ;;  %s4846_s10 = inlined_call_operand.vmem [shape: f32[2,1,32], index: 10, kind: input, shape index: {}]   ;;  %s4847_s11 = inlined_call_operand.vmem [shape: f32[2,1,32], index: 11, kind: input, shape index: {}]   ;;  %s4848_s12 = inlined_call_operand.vmem [shape: f32[2,32,128], index: 12, kind: input, shape index: {}]   ;;  %s4849_s13 = inlined_call_operand.vmem [shape: f32[2,1,128], index: 13, kind: input, shape index: {}]   ;;  %s4850_s14 = inlined_call_operand.vmem [shape: f32[2,128,32], index: 14, kind: input, shape index: {}]   ;;  %s4851_s15 = inlined_call_operand.vmem [shape: f32[2,1,32], index: 15, kind: input, shape index: {}]   ;;  %s4852_s16 = inlined_call_operand.vmem [shape: f32[1,32], index: 16, kind: input, shape index: {}]   ;;  %s4853_s17 = inlined_call_operand.vmem [shape: f32[1,32], index: 17, kind: input, shape index: {}]   ;;  %s4854_s18 = inlined_call_operand.hbm [shape: f32[2,32], index: 18, kind: output, shape index: {}]  }
   0x1   :  { %4871 = sst [smem:[#allocation5_spill]] %s4836_s0 }
   0x2   :  { %4872 = sst [smem:[#allocation6_spill]] %s4837_s1 }
   0x3   :  { %4873 = sst [smem:[#allocation7_spill]] %s4838_s2 }
   0x4   :  { %s4874_s29 = sld [smem:[#allocation6_spill]]  ;;  %v4010_v3 = vmov 0.0|0.0   ;;  %vm90_vm0 = vcmask 523264   ;;  %s4875_s19 = sld [smem:[#allocation5_spill]] }
   0x5   :  { %3529 = vmatprep.subr.bf16.mxu0 %v4010_v3 }
   0xa   :  { %v64_v0 = vld [vmem:[%s4874_s29] sm:$0xff]  ;;  %v65_v1 = vld [vmem:[%s4874_s29 + $0x8] sm:$0xff]  ;;  %v66_v2 = vld [vmem:[%s4874_s29 + $0x10] sm:$0xff] }
   0xb   :  { %v3530_v4 = vpack.c.bf16 %v65_v1, %v64_v0  ;;  %v67_v5 = vld [vmem:[%s4874_s29 + $0x18] sm:$0xff]  ;;  %v68_v7 = vld [vmem:[%s4874_s29 + $0x20] sm:$0xff]  ;;  %v69_v8 = vld [vmem:[%s4874_s29 + $0x28] sm:$0xff] }
   0xc   :  { %v3533_v6 = vpack.c.bf16 %v67_v5, %v66_v2  ;;  %v3536_v9 = vpack.c.bf16 %v69_v8, %v68_v7  ;;  %v70_v10 = vld [vmem:[%s4874_s29 + $0x30] sm:$0xff]  ;;  %v71_v11 = vld [vmem:[%s4874_s29 + $0x38] sm:$0xff]  ;;  %v61_v12 = vld [vmem:[%s4875_s19 + $0x8] sm:$0xff] }
   0xd   :  { %3531 = vmatpush1.bf16.msra.mxu0 %v3530_v4  ;;  %3012 = vmatprep.mubr.msk.f32.mxu0 %vm90_vm0, %v61_v12 }
   0xe   :  { %3532 = vmatprep.subr.bf16.mxu0 %v4010_v3 }
  0x11   :  { %3534 = vmatpush1.bf16.msra.mxu0 %v3533_v6 }
  0x12   :  { %3535 = vmatprep.subr.bf16.mxu0 %v4010_v3 }
  0x13   :  { %23 = vsyncpa [#allocation3], 0  ;;  %v3539_v13 = vpack.c.bf16 %v71_v11, %v70_v10  ;;  %v72_v14 = vld [vmem:[%s4874_s29 + $0x40] sm:$0xff]  ;;  %v73_v15 = vld [vmem:[%s4874_s29 + $0x48] sm:$0xff]  ;;  %s4876_s1 = sld [smem:[#allocation7_spill]]  ;;  %vm176_vm1 = vcmask 261120  }
  0x14   :  { %v3542_v16 = vpack.c.bf16 %v73_v15, %v72_v14  ;;  %v74_v17 = vld [vmem:[%s4874_s29 + $0x50] sm:$0xff]  ;;  %v75_v18 = vld [vmem:[%s4874_s29 + $0x58] sm:$0xff]  ;;  %v76_v20 = vld [vmem:[%s4874_s29 + $0x60] sm:$0xff]  ;;  %vm180_vm2 = vcmask 254976   ;;  %vm326_vm7 = vcmask 64512   ;;  %s4012_s20 = smov 88  }
  0x15   :  { %3537 = vmatpush1.bf16.msra.mxu0 %v3536_v9  ;;  %v3545_v19 = vpack.c.bf16 %v75_v18, %v74_v17  ;;  %v77_v21 = vld [vmem:[%s4874_s29 + $0x68] sm:$0xff]  ;;  %v78_v23 = vld [vmem:[%s4874_s29 + $0x70] sm:$0xff]  ;;  %v79_v24 = vld [vmem:[%s4874_s29 + $0x78] sm:$0xff]  ;;  %s4013_s21 = smov 120   ;;  %vm414_vm9 = vcmask 80896   ;;  %vm418_vm10 = vcmask 74752  }
  0x16   :  { %3538 = vmatprep.subr.bf16.mxu0 %v4010_v3  ;;  %v3548_v22 = vpack.c.bf16 %v77_v21, %v76_v20  ;;  %v3551_v25 = vpack.c.bf16 %v79_v24, %v78_v23  ;;  %v80_v26 = vld [vmem:[%s4874_s29 + $0x80] sm:$0xff]  ;;  %v81_v27 = vld [vmem:[%s4874_s29 + $0x88] sm:$0xff]  ;;  %v82_v29 = vld [vmem:[%s4874_s29 + $0x90] sm:$0xff]  ;;  %s4870_s24 = smov 64   ;;  %vm449_vm11 = vcmask 1041408   ;;  %vm4015_vm12 = vmmov 1  }
  0x17   :  { %v3554_v28 = vpack.c.bf16 %v81_v27, %v80_v26  ;;  %v83_v30 = vld [vmem:[%s4874_s29 + $0x98] sm:$0xff]  ;;  %v84_v32 = vld [vmem:[%s4874_s29 + $0xa0] sm:$0xff]  ;;  %v85_v33 = vld [vmem:[%s4874_s29 + $0xa8] sm:$0xff]  ;;  %s4866_s25 = smov 56   ;;  %s4017_s26 = smov 112   ;;  %vm1168_vm14 = vcmask 130048  }
  0x18   :  { %v3557_v31 = vpack.c.bf16 %v83_v30, %v82_v29  ;;  %v3560_v34 = vpack.c.bf16 %v85_v33, %v84_v32  ;;  %v86_v35 = vld [vmem:[%s4874_s29 + $0xb0] sm:$0xff]  ;;  %v87_v36 = vld [vmem:[%s4874_s29 + $0xb8] sm:$0xff]  ;;  %v60_v38 = vld [vmem:[%s4875_s19] sm:$0xff]  ;;  %s4018_s27 = smov 80   ;;  %s4869_s28 = smov 48   ;;  %vm1171_vm15 = vcmask 195584  }
  0x19   :  { %3540 = vmatpush1.bf16.msra.mxu0 %v3539_v13  ;;  %v3563_v37 = vpack.c.bf16 %v87_v36, %v86_v35  ;;  %v63_v39 = vld [vmem:[%s4875_s19 + $0x18] sm:$0x3]  ;;  %v62_v40 = vld [vmem:[%s4875_s19 + $0x10] sm:$0x3]  ;;  %v88_v41 = vld [vmem:[%s4876_s1] sm:$0xff]  ;;  %s4863_s30 = smov 104  }
  0x1a   :  { %3541 = vmatprep.subr.bf16.mxu0 %v4010_v3  ;;  %v89_v45 = vld [vmem:[%s4876_s1 + $0x8] sm:$0x3]  ;;  %v235_v61 = vld [vmem:[%s4843_s7] sm:$0xff]  ;;  %v237_v63 = vld [vmem:[%s4843_s7 + $0x10] sm:$0xff]  ;;  %s4011_s1 = smov 96   ;;  %s4865_s29 = smov 72  }
  0x1b   :  { %v236_v62 = vld [vmem:[%s4843_s7 + $0x8] sm:$0xff]  ;;  %v238_v1 = vld [vmem:[%s4843_s7 + $0x18] sm:$0xff]  ;;  %v3014_v21 = vld [vmem:[%s4841_s5] ss:$0 sm:$0xff]  ;;  %s4860_s0 = smov 40   ;;  %s4861_s19 = smov 8  }
  0x1c   :  { %v3565_v0 = vpack.c.bf16 %v236_v62, %v235_v61  ;;  %v3569_v2 = vpack.c.bf16 %v238_v1, %v237_v63  ;;  %v3015_v23 = vld [vmem:[%s4842_s6] ss:$0 sm:$0xff]  ;;  %vm4280_vm8 = vmpackc.low %vm326_vm7, %vm326_vm7  ;;  %s4858_s22 = smov 16   ;;  %s4867_s2 = smov 24  }
  0x1d   :  { %3543 = vmatpush1.bf16.msra.mxu0 %v3542_v16  ;;  %vm4308_vm13 = vmpackc.low %vm449_vm11, %vm4015_vm12 }
  0x1e   :  { %3544 = vmatprep.subr.bf16.mxu0 %v4010_v3 }
  0x21   :  { %3546 = vmatpush1.bf16.msra.mxu0 %v3545_v19 }
  0x22   :  { %3547 = vmatprep.subr.bf16.mxu0 %v4010_v3 }
  0x25   :  { %3549 = vmatpush1.bf16.msra.mxu0 %v3548_v22 }
  0x26   :  { %3550 = vmatprep.subr.bf16.mxu0 %v4010_v3 }
  0x29   :  { %3552 = vmatpush1.bf16.msra.mxu0 %v3551_v25 }
  0x2a   :  { %3553 = vmatprep.subr.bf16.mxu0 %v4010_v3 }
  0x2d   :  { %3555 = vmatpush1.bf16.msra.mxu0 %v3554_v28 }
  0x2e   :  { %3556 = vmatprep.subr.bf16.mxu0 %v4010_v3 }
  0x31   :  { %3558 = vmatpush1.bf16.msra.mxu0 %v3557_v31 }
  0x32   :  { %3559 = vmatprep.subr.bf16.mxu0 %v4010_v3 }
  0x35   :  { %3561 = vmatpush1.bf16.msra.mxu0 %v3560_v34 }
  0x36   :  { %3562 = vmatprep.subr.bf16.mxu0 %v4010_v3 }
  0x39   :  { %3564 = vmatpush1.bf16.msra.mxu0 %v3563_v37 }
  0x3a   :  { %3566 = vmatprep.subr.bf16.mxu0 %v3565_v0 }
  0x3c   :  { %162 = vmatmul.mubr.f32.vlgmr.msra.gmra.mrb[0].mxu0 %v60_v38 }
  0x3d   :  { %3013 = vmatprep.mubr.msk.f32.mxu0 %vm90_vm0, %v63_v39  ;;  %3568 = vmatpush3.bf16.msra.mxu0 %v3565_v0 }
  0x3e   :  { %3570 = vmatprep.subr.bf16.mxu0 %v3569_v2 }
  0x40   :  { %167 = vmatmul.mubr.f32.gmra.mrb[2].mxu0 %v62_v40  ;;  %v4293_v40 = vld [vmem:[%s4839_s3] sm:$0xff] }
  0x41   :  { %3572 = vmatpush3.bf16.msra.mxu0 %v3569_v2 }
 0x10f   :  { %v163_v42 = vpop.f32.mrb[0].mxu0 }
 0x110   :  { %v4225_v43 = vadd.f32 %v163_v42, %v88_v41  ;;  %v165_v44 = vpop.f32.mrb[1].mxu0 }
 0x111   :  { %v4298_v44 = vld [vmem:[%s4839_s3 + $0x8] sm:$0x3] }
 0x112   :  { %v177_v46 = vsel %vm176_vm1, %v4225_v43, 0.0 }
 0x113   :  { %v168_v47 = vpop.f32.mrb[2].mxu0  ;;  %178 = vadd.xlane.f32.xlu0 %v177_v46 }
 0x114   :  { %v4232_v48 = vadd.f32 %v168_v47, %v89_v45  ;;  %v170_v49 = vpop.f32.mrb[3].mxu0 }
 0x116   :  { %v181_v50 = vsel %vm180_vm2, %v4232_v48, 0.0 }
 0x117   :  { %182 = vadd.xlane.f32.xlu0 %v181_v50 }
 0x1a0   :  { %v179_v51 = vpop.xlane.xlu0 %178 }
 0x1a1   :  { %v185_v52 = vmul.f32 0.03125, %v179_v51 }
 0x1a3   :  { %v187_v53 = vsub.f32 %v4225_v43, %v185_v52 }
 0x1a4   :  { %v183_v54 = vpop.xlane.xlu0 %182 }
 0x1a5   :  { %v186_v55 = vmul.f32 0.03125, %v183_v54  ;;  %v189_v56 = vmul.f32 %v187_v53, %v187_v53 }
 0x1a7   :  { %v188_v57 = vsub.f32 %v4232_v48, %v186_v55  ;;  %v191_v58 = vsel %vm176_vm1, %v189_v56, 0.0 }
 0x1a8   :  { %192 = vadd.xlane.f32.xlu1 %v191_v58 }
 0x1a9   :  { %v190_v59 = vmul.f32 %v188_v57, %v188_v57 }
 0x1ab   :  { %v194_v60 = vsel %vm180_vm2, %v190_v59, 0.0 }
 0x1ac   :  { %195 = vadd.xlane.f32.xlu1 %v194_v60 }
 0x235   :  { %v193_v4 = vpop.xlane.xlu1 %192 }
 0x236   :  { %v197_v5 = vmul.f32 0.03125, %v193_v4 }
 0x238   :  { %v199_v6 = vadd.f32 1e-05, %v197_v5 }
 0x239   :  { %v196_v7 = vpop.xlane.xlu1 %195 }
 0x23a   :  { %3876 = vrsqrt.f32 %v199_v6  ;;  %v198_v8 = vmul.f32 0.03125, %v196_v7  ;;  %vm203_vm3 = vcmp.eq.f32.partialorder %v199_v6, inf  ;;  %v206_v12 = vand.u32 2147483648, %v199_v6 }
 0x23b   :  { %vm205_vm4 = vcmp.eq.f32.partialorder %v199_v6, 0.0 }
 0x23c   :  { %v200_v9 = vadd.f32 1e-05, %v198_v8 }
 0x23e   :  { %3878 = vrsqrt.f32 %v200_v9  ;;  %vm210_vm5 = vcmp.eq.f32.partialorder %v200_v9, inf  ;;  %v213_v17 = vand.u32 2147483648, %v200_v9  ;;  %vm212_vm6 = vcmp.eq.f32.partialorder %v200_v9, 0.0 }
 0x244   :  { %v3877_v10 = vpop.eup %3876 }
 0x245   :  { %v202_v11 = vmul.f32 %v3877_v10, %v199_v6 }
 0x247   :  { %v204_v13 = vsel %vm203_vm3, %v199_v6, %v202_v11 }
 0x248   :  { %v207_v14 = vsel %vm205_vm4, %v206_v12, %v204_v13  ;;  %v3879_v15 = vpop.eup %3878 }
 0x249   :  { %3880 = vrcp.f32 %v207_v14  ;;  %v209_v16 = vmul.f32 %v3879_v15, %v200_v9 }
 0x24b   :  { %v211_v18 = vsel %vm210_vm5, %v200_v9, %v209_v16 }
 0x24c   :  { %v214_v19 = vsel %vm212_vm6, %v213_v17, %v211_v18 }
 0x24d   :  { %3882 = vrcp.f32 %v214_v19 }
 0x253   :  { %v3881_v20 = vpop.eup %3880 }
 0x254   :  { %v216_v22 = vmul.f32 %v3881_v20, %v187_v53 }
 0x256   :  { %v225_v24 = vmul.f32 %v3014_v21, %v216_v22 }
 0x257   :  { %v3883_v25 = vpop.eup %3882 }
 0x258   :  { %v233_v26 = vadd.f32 %v3015_v23, %v225_v24  ;;  %v218_v27 = vmul.f32 %v3883_v25, %v188_v57 }
 0x25a   :  { %3282 = vmatprep.mubr.msk.f32.mxu0 %vm176_vm1, %v233_v26  ;;  %v226_v28 = vmul.f32 %v3014_v21, %v218_v27 }
 0x25c   :  { %v234_v29 = vadd.f32 %v3015_v23, %v226_v28 }
 0x25e   :  { %3283 = vmatmul.mubr.msk.f32.vlgmr.msra.gmra.mrb[4].mxu0 %vm176_vm1, %v234_v29 }
 0x331   :  { %v4260_v30 = vpop.f32.mrb[4].mxu0 }
 0x332   :  { %v4262_v31 = vpop.f32.mrb[5].mxu0 }
 0x333   :  { %3289 = vmatprep.mubr.msk.f32.mxu0 %vm326_vm7, %v4262_v31  ;;  %v4268_v32 = vpack.i.bf16 %v4260_v30, %v4262_v31 }
 0x335   :  { %3797 = vrot.lane.b32.xlu0 %v4268_v32, %s4011_s1 }
 0x339   :  { %3807 = vrot.lane.b32.xlu0 %v4268_v32, %s4012_s20 }
 0x33d   :  { %527 = vrot.lane.b32.xlu0 %v4262_v31, %s4013_s21 }
 0x341   :  { %529 = vrot.lane.b32.xlu0 %v4260_v30, %s4013_s21 }
 0x3a7   :  { %v3798_v33 = vpop.permute.xlu0 %3797 }
 0x3a8   :  { %v3800_v34 = vunpack.i.h.bf16 %v3798_v33  ;;  %v3799_v35 = vunpack.i.l.bf16 %v3798_v33 }
 0x3aa   :  { %v3573_v37 = vpack.c.bf16 %v3800_v34, %v3799_v35 }
 0x3ab   :  { %v3808_v62 = vpop.permute.xlu0 %3807 }
 0x3ac   :  { %3575 = vmatprep.subr.msk.bf16.mxu0 %vm4280_vm8, %v3573_v37  ;;  %v3810_v0 = vunpack.i.h.bf16 %v3808_v62  ;;  %v3809_v1 = vunpack.i.l.bf16 %v3808_v62 }
 0x3ad   :  { %3578 = vmatpush3.bf16.xpose.msk.msra.mxu0 %vm4280_vm8, %v3573_v37 }
 0x3ae   :  { %v3585_v7 = vpack.c.bf16 %v3810_v0, %v3809_v1 }
 0x3af   :  { %v528_v12 = vpop.permute.xlu0 %527 }
 0x3b3   :  { %v530_v13 = vpop.permute.xlu0 %529 }
 0x3b4   :  { %3290 = vmatmul.mubr.msk.f32.vlgmr.msra.gmra.mrb[6].mxu0 %vm326_vm7, %v4260_v30 }
 0x487   :  { %v3291_v38 = vpop.f32.mrb[6].mxu0 }
 0x488   :  { %v401_v39 = vpop.f32.mrb[7].mxu0  ;;  %v411_v41 = vmul.f32 0.35355338, %v3291_v38 }
 0x489   :  { %v410_v42 = vmul.f32 0.35355338, %v401_v39 }
 0x48a   :  { %v413_v47 = vadd.f32 %v411_v41, %v4298_v44 }
 0x48b   :  { %v412_v45 = vadd.f32 %v410_v42, %v4293_v40 }
 0x48c   :  { %v419_v49 = vsel %vm418_vm10, %v413_v47, -inf }
 0x48d   :  { %v415_v46 = vsel %vm414_vm9, %v412_v45, -inf }
 0x48e   :  { %416 = vmax.xlane.f32.xlu1 %v415_v46 }
 0x492   :  { %420 = vmax.xlane.f32.xlu1 %v419_v49 }
 0x51b   :  { %v417_v50 = vpop.xlane.xlu1 %416 }
 0x51c   :  { %v422_v51 = vsub.f32 %v412_v45, %v417_v50 }
 0x51e   :  { %v424_v54 = vmul.f32 1.442695, %v422_v51 }
 0x51f   :  { %v421_v52 = vpop.xlane.xlu1 %420 }
 0x520   :  { %v423_v53 = vsub.f32 %v413_v47, %v421_v52 }
 0x522   :  { %v426_v55 = vmul.f32 1.442695, %v423_v53 }
 0x524   :  { %3884 = vpow2.f32 %v426_v55 }
 0x525   :  { %3886 = vpow2.f32 %v424_v54 }
 0x52e   :  { %v3885_v56 = vpop.eup %3884 }
 0x52f   :  { %v431_v57 = vsel %vm418_vm10, %v3885_v56, 0.0  ;;  %v3887_v58 = vpop.eup %3886 }
 0x530   :  { %432 = vadd.xlane.f32.xlu1 %v431_v57  ;;  %v428_v59 = vsel %vm414_vm9, %v3887_v58, 0.0 }
 0x534   :  { %429 = vadd.xlane.f32.xlu1 %v428_v59 }
 0x545   :  { %3802 = vrot.lane.b32.xlu1 %v4268_v32, %s4870_s24  ;;  %s4886_s24 = smov 40  }
 0x5bd   :  { %v433_v60 = vpop.xlane.xlu1 %432 }
 0x5be   :  { %3888 = vrcp.f32 %v433_v60 }
 0x5c1   :  { %v430_v61 = vpop.xlane.xlu1 %429 }
 0x5c2   :  { %3890 = vrcp.f32 %v430_v61 }
 0x5c5   :  { %v3803_v63 = vpop.permute.xlu1 %3802 }
 0x5c6   :  { %v3805_v2 = vunpack.i.h.bf16 %v3803_v63  ;;  %v3804_v4 = vunpack.i.l.bf16 %v3803_v63 }
 0x5c8   :  { %v3579_v6 = vpack.c.bf16 %v3805_v2, %v3804_v4  ;;  %v3889_v8 = vpop.eup %3888 }
 0x5c9   :  { %v437_v11 = vmul.f32 %v3889_v8, %v3885_v56 }
 0x5ca   :  { %3581 = vmatprep.subr.msk.bf16.mxu1 %vm4308_vm13, %v3579_v6 }
 0x5cb   :  { %3584 = vmatpush3.bf16.msk.msra.mxu1 %vm4308_vm13, %v3579_v6 }
 0x5cc   :  { %v3891_v9 = vpop.eup %3890  ;;  %3587 = vmatprep.subr.msk.bf16.mxu1 %vm4280_vm8, %v3585_v7 }
 0x5cd   :  { %v436_v10 = vmul.f32 %v3891_v9, %v3887_v58 }
 0x5cf   :  { %3296 = vmatprep.mubr.msk.f32.mxu1 %vm414_vm9, %v436_v10 }
 0x5d0   :  { %3297 = vmatmul.mubr.msk.f32.vlgmr.msra.gmra.mrb[0].mxu1 %vm414_vm9, %v437_v11 }
 0x5d1   :  { %3303 = vmatprep.mubr.msk.f32.mxu1 %vm326_vm7, %v528_v12 }
 0x5d4   :  { %3590 = vmatpush3.bf16.xpose.msk.msra.mxu1 %vm4280_vm8, %v3585_v7 }
 0x5db   :  { %3304 = vmatmul.mubr.msk.f32.vlgmr.msra.gmra.mrb[2].mxu1 %vm326_vm7, %v530_v13 }
 0x6a3   :  { %v4324_v14 = vpop.f32.mrb[0].mxu1 }
 0x6a4   :  { %v4326_v15 = vpop.f32.mrb[1].mxu1 }
 0x6ae   :  { %v3305_v16 = vpop.f32.mrb[2].mxu1 }
 0x6af   :  { %v619_v17 = vmul.f32 0.35355338, %v3305_v16  ;;  %v609_v18 = vpop.f32.mrb[3].mxu1 }
 0x6b0   :  { %v618_v19 = vmul.f32 0.35355338, %v609_v18 }
 0x6b1   :  { %v621_v20 = vadd.f32 %v619_v17, %v4298_v44 }
 0x6b2   :  { %v620_v21 = vadd.f32 %v618_v19, %v4293_v40 }
 0x6b3   :  { %v625_v22 = vsel %vm418_vm10, %v621_v20, -inf }
 0x6b4   :  { %626 = vmax.xlane.f32.xlu0 %v625_v22  ;;  %v622_v23 = vsel %vm414_vm9, %v620_v21, -inf }
 0x6b5   :  { %623 = vmax.xlane.f32.xlu1 %v622_v23 }
 0x6c6   :  { %3812 = vrot.lane.b32.xlu1 %v4268_v32, %s4866_s25 }
 0x6ca   :  { %732 = vrot.lane.b32.xlu1 %v4262_v31, %s4017_s26 }
 0x6ce   :  { %734 = vrot.lane.b32.xlu1 %v4260_v30, %s4017_s26 }
 0x741   :  { %v627_v24 = vpop.xlane.xlu0 %626 }
 0x742   :  { %v629_v25 = vsub.f32 %v621_v20, %v627_v24  ;;  %v624_v26 = vpop.xlane.xlu1 %623 }
 0x743   :  { %v628_v27 = vsub.f32 %v620_v21, %v624_v26 }
 0x744   :  { %v632_v28 = vmul.f32 1.442695, %v629_v25 }
 0x745   :  { %v630_v29 = vmul.f32 1.442695, %v628_v27 }
 0x746   :  { %3892 = vpow2.f32 %v632_v28  ;;  %v3813_v33 = vpop.permute.xlu1 %3812 }
 0x747   :  { %v3815_v34 = vunpack.i.h.bf16 %v3813_v33  ;;  %v3814_v35 = vunpack.i.l.bf16 %v3813_v33  ;;  %3894 = vpow2.f32 %v630_v29 }
 0x749   :  { %v3591_v37 = vpack.c.bf16 %v3815_v34, %v3814_v35 }
 0x74a   :  { %v733_v56 = vpop.permute.xlu1 %732 }
 0x74b   :  { %3593 = vmatprep.subr.msk.bf16.mxu1 %vm4308_vm13, %v3591_v37 }
 0x74c   :  { %3596 = vmatpush3.bf16.msk.msra.mxu1 %vm4308_vm13, %v3591_v37 }
 0x74e   :  { %v735_v57 = vpop.permute.xlu1 %734 }
 0x750   :  { %v3893_v38 = vpop.eup %3892 }
 0x751   :  { %v637_v39 = vsel %vm418_vm10, %v3893_v38, 0.0  ;;  %v3895_v41 = vpop.eup %3894 }
 0x752   :  { %638 = vadd.xlane.f32.xlu0 %v637_v39  ;;  %v634_v42 = vsel %vm414_vm9, %v3895_v41, 0.0 }
 0x756   :  { %635 = vadd.xlane.f32.xlu0 %v634_v42 }
 0x76c   :  { %3817 = vrot.lane.b32.xlu0 %v4268_v32, %s4018_s27 }
 0x7df   :  { %v639_v45 = vpop.xlane.xlu0 %638 }
 0x7e0   :  { %3896 = vrcp.f32 %v639_v45 }
 0x7e3   :  { %v636_v46 = vpop.xlane.xlu0 %635 }
 0x7e4   :  { %3898 = vrcp.f32 %v636_v46 }
 0x7e7   :  { %v3818_v47 = vpop.permute.xlu0 %3817 }
 0x7e8   :  { %v3820_v49 = vunpack.i.h.bf16 %v3818_v47  ;;  %v3819_v50 = vunpack.i.l.bf16 %v3818_v47 }
 0x7ea   :  { %v3597_v51 = vpack.c.bf16 %v3820_v49, %v3819_v50  ;;  %v3897_v52 = vpop.eup %3896 }
 0x7eb   :  { %v643_v55 = vmul.f32 %v3897_v52, %v3893_v38 }
 0x7ec   :  { %3599 = vmatprep.subr.msk.bf16.mxu1 %vm4280_vm8, %v3597_v51 }
 0x7ee   :  { %v3899_v53 = vpop.eup %3898 }
 0x7ef   :  { %v642_v54 = vmul.f32 %v3899_v53, %v3895_v41 }
 0x7f1   :  { %3310 = vmatprep.mubr.msk.f32.mxu1 %vm414_vm9, %v642_v54 }
 0x7f2   :  { %3311 = vmatmul.mubr.msk.f32.vlgmr.msra.gmra.mrb[4].mxu1 %vm414_vm9, %v643_v55 }
 0x7f3   :  { %3602 = vmatpush3.bf16.xpose.msk.msra.mxu1 %vm4280_vm8, %v3597_v51  ;;  %3317 = vmatprep.mubr.msk.f32.mxu1 %vm326_vm7, %v733_v56 }
 0x7fa   :  { %3318 = vmatmul.mubr.msk.f32.vlgmr.msra.gmra.mrb[6].mxu1 %vm326_vm7, %v735_v57 }
 0x8c5   :  { %v4354_v58 = vpop.f32.mrb[4].mxu1 }
 0x8c6   :  { %v4356_v59 = vpop.f32.mrb[5].mxu1 }
 0x8cd   :  { %v3319_v60 = vpop.f32.mrb[6].mxu1 }
 0x8ce   :  { %v824_v61 = vmul.f32 0.35355338, %v3319_v60  ;;  %v814_v62 = vpop.f32.mrb[7].mxu1 }
 0x8cf   :  { %v823_v63 = vmul.f32 0.35355338, %v814_v62 }
 0x8d0   :  { %v826_v0 = vadd.f32 %v824_v61, %v4298_v44 }
 0x8d1   :  { %v825_v1 = vadd.f32 %v823_v63, %v4293_v40 }
 0x8d2   :  { %v830_v2 = vsel %vm418_vm10, %v826_v0, -inf }
 0x8d3   :  { %831 = vmax.xlane.f32.xlu0 %v830_v2  ;;  %v827_v4 = vsel %vm414_vm9, %v825_v1, -inf }
 0x8d4   :  { %828 = vmax.xlane.f32.xlu1 %v827_v4 }
 0x8e5   :  { %3822 = vrot.lane.b32.xlu1 %v4268_v32, %s4869_s28  ;;  %s4887_s28 = smov 8  }
 0x8e9   :  { %937 = vrot.lane.b32.xlu1 %v4262_v31, %s4863_s30 }
 0x8ed   :  { %939 = vrot.lane.b32.xlu1 %v4260_v30, %s4863_s30 }
 0x960   :  { %v832_v6 = vpop.xlane.xlu0 %831 }
 0x961   :  { %v834_v7 = vsub.f32 %v826_v0, %v832_v6  ;;  %v829_v8 = vpop.xlane.xlu1 %828 }
 0x962   :  { %v833_v9 = vsub.f32 %v825_v1, %v829_v8  ;;  %v1174_v8 = vld [vmem:[%s4844_s8] sm:$0xff] }
 0x963   :  { %v837_v10 = vmul.f32 1.442695, %v834_v7 }
 0x964   :  { %v835_v11 = vmul.f32 1.442695, %v833_v9  ;;  %v1176_v9 = vld [vmem:[%s4844_s8 + $0x10] sm:$0xff] }
 0x965   :  { %3900 = vpow2.f32 %v837_v10  ;;  %v3823_v12 = vpop.permute.xlu1 %3822 }
 0x966   :  { %v3825_v13 = vunpack.i.h.bf16 %v3823_v12  ;;  %v3824_v16 = vunpack.i.l.bf16 %v3823_v12  ;;  %3902 = vpow2.f32 %v835_v11  ;;  %v1177_v11 = vld [vmem:[%s4844_s8 + $0x18] sm:$0xff] }
 0x967   :  { %v3625_v12 = vpack.c.bf16 %v1177_v11, %v1176_v9 }
 0x968   :  { %v3603_v17 = vpack.c.bf16 %v3825_v13, %v3824_v16 }
 0x969   :  { %v938_v33 = vpop.permute.xlu1 %937 }
 0x96a   :  { %3605 = vmatprep.subr.msk.bf16.mxu1 %vm4308_vm13, %v3603_v17 }
 0x96b   :  { %3608 = vmatpush3.bf16.msk.msra.mxu1 %vm4308_vm13, %v3603_v17 }
 0x96d   :  { %v940_v34 = vpop.permute.xlu1 %939 }
 0x96f   :  { %v3901_v31 = vpop.eup %3900 }
 0x970   :  { %v842_v30 = vsel %vm418_vm10, %v3901_v31, 0.0  ;;  %v3903_v18 = vpop.eup %3902 }
 0x971   :  { %843 = vadd.xlane.f32.xlu0 %v842_v30  ;;  %v839_v19 = vsel %vm414_vm9, %v3903_v18, 0.0 }
 0x975   :  { %840 = vadd.xlane.f32.xlu0 %v839_v19 }
 0x98b   :  { %3827 = vrot.lane.b32.xlu0 %v4268_v32, %s4865_s29 }
 0x9fe   :  { %v844_v20 = vpop.xlane.xlu0 %843 }
 0x9ff   :  { %3904 = vrcp.f32 %v844_v20 }
 0xa02   :  { %v841_v21 = vpop.xlane.xlu0 %840 }
 0xa03   :  { %3906 = vrcp.f32 %v841_v21 }
 0xa06   :  { %v3828_v22 = vpop.permute.xlu0 %3827 }
 0xa07   :  { %v3830_v23 = vunpack.i.h.bf16 %v3828_v22  ;;  %v3829_v24 = vunpack.i.l.bf16 %v3828_v22 }
 0xa09   :  { %v3609_v25 = vpack.c.bf16 %v3830_v23, %v3829_v24  ;;  %v3905_v26 = vpop.eup %3904 }
 0xa0a   :  { %v848_v29 = vmul.f32 %v3905_v26, %v3901_v31 }
 0xa0b   :  { %3611 = vmatprep.subr.msk.bf16.mxu1 %vm4280_vm8, %v3609_v25 }
 0xa0d   :  { %v3907_v27 = vpop.eup %3906 }
 0xa0e   :  { %v847_v28 = vmul.f32 %v3907_v27, %v3903_v18 }
 0xa10   :  { %3324 = vmatprep.mubr.msk.f32.mxu1 %vm414_vm9, %v847_v28 }
 0xa11   :  { %3325 = vmatmul.mubr.msk.f32.vlgmr.msra.gmra.mrb[8].mxu1 %vm414_vm9, %v848_v29 }
 0xa12   :  { %3614 = vmatpush3.bf16.xpose.msk.msra.mxu1 %vm4280_vm8, %v3609_v25  ;;  %3331 = vmatprep.mubr.msk.f32.mxu1 %vm326_vm7, %v938_v33 }
 0xa19   :  { %3332 = vmatmul.mubr.msk.f32.vlgmr.msra.gmra.mrb[10].mxu1 %vm326_vm7, %v940_v34 }
 0xae4   :  { %v3326_v35 = vpop.f32.mrb[8].mxu1 }
 0xae5   :  { %v928_v37 = vpop.f32.mrb[9].mxu1 }
 0xaec   :  { %v3333_v38 = vpop.f32.mrb[10].mxu1 }
 0xaed   :  { %v1029_v39 = vmul.f32 0.35355338, %v3333_v38  ;;  %v1019_v41 = vpop.f32.mrb[11].mxu1 }
 0xaee   :  { %v1028_v42 = vmul.f32 0.35355338, %v1019_v41 }
 0xaef   :  { %v1031_v45 = vadd.f32 %v1029_v39, %v4298_v44 }
 0xaf0   :  { %v1030_v46 = vadd.f32 %v1028_v42, %v4293_v40 }
 0xaf1   :  { %v1035_v47 = vsel %vm418_vm10, %v1031_v45, -inf }
 0xaf2   :  { %1036 = vmax.xlane.f32.xlu0 %v1035_v47  ;;  %v1032_v49 = vsel %vm414_vm9, %v1030_v46, -inf }
 0xaf3   :  { %1033 = vmax.xlane.f32.xlu1 %v1032_v49 }
 0xb04   :  { %3832 = vrot.lane.b32.xlu1 %v4268_v32, %s4860_s0  ;;  %s4885_s0 = smov 104  }
 0xb08   :  { %1146 = vrot.lane.b32.xlu1 %v4354_v58, %s4861_s19 }
 0xb0c   :  { %1152 = vrot.lane.b32.xlu1 %v928_v37, %s4858_s22 }
 0xb10   :  { %1154 = vrot.lane.b32.xlu1 %v3326_v35, %s4858_s22 }
 0xb7f   :  { %v1037_v50 = vpop.xlane.xlu0 %1036 }
 0xb80   :  { %v1039_v51 = vsub.f32 %v1031_v45, %v1037_v50  ;;  %v1034_v52 = vpop.xlane.xlu1 %1033  ;;  %v1326_v50 = vld [vmem:[%s4848_s12] sm:$0xff] }
 0xb81   :  { %v1038_v53 = vsub.f32 %v1030_v46, %v1034_v52  ;;  %v1328_v52 = vld [vmem:[%s4848_s12 + $0x10] sm:$0xff] }
 0xb82   :  { %v1042_v54 = vmul.f32 1.442695, %v1039_v51  ;;  %v1327_v51 = vld [vmem:[%s4848_s12 + $0x8] sm:$0xff] }
 0xb83   :  { %v1040_v55 = vmul.f32 1.442695, %v1038_v53  ;;  %v3629_v53 = vpack.c.bf16 %v1327_v51, %v1326_v50 }
 0xb84   :  { %v3833_v56 = vpop.permute.xlu1 %3832 }
 0xb85   :  { %3908 = vpow2.f32 %v1040_v55  ;;  %v3835_v57 = vunpack.i.h.bf16 %v3833_v56  ;;  %v3834_v60 = vunpack.i.l.bf16 %v3833_v56  ;;  %v1428_v56 = vld [vmem:[%s4850_s14] sm:$0xff] }
 0xb86   :  { %3910 = vpow2.f32 %v1042_v54  ;;  %v1329_v54 = vld [vmem:[%s4848_s12 + $0x18] sm:$0xff] }
 0xb87   :  { %v3615_v32 = vpack.c.bf16 %v3835_v57, %v3834_v60  ;;  %v3633_v55 = vpack.c.bf16 %v1329_v54, %v1328_v52  ;;  %v1429_v57 = vld [vmem:[%s4850_s14 + $0x8] sm:$0xff]  ;;  %v1430_v60 = vld [vmem:[%s4850_s14 + $0x10] sm:$0xff] }
 0xb88   :  { %v1147_v17 = vpop.permute.xlu1 %1146 }
 0xb89   :  { %3617 = vmatprep.subr.msk.bf16.mxu0 %vm4308_vm13, %v3615_v32  ;;  %v1167_v21 = vsel %vm326_vm7, %v4324_v14, %v1147_v17 }
 0xb8a   :  { %3620 = vmatpush3.bf16.msk.msra.mxu0 %vm4308_vm13, %v3615_v32  ;;  %v3637_v32 = vpack.c.bf16 %v1429_v57, %v1428_v56 }
 0xb8b   :  { %3630 = vmatprep.subr.bf16.mxu0 %v3629_v53 }
 0xb8c   :  { %v1153_v31 = vpop.permute.xlu1 %1152 }
 0xb8f   :  { %v3909_v58 = vpop.eup %3908 }
 0xb90   :  { %v1044_v61 = vsel %vm414_vm9, %v3909_v58, 0.0  ;;  %v3911_v62 = vpop.eup %3910  ;;  %v1155_v18 = vpop.permute.xlu1 %1154 }
 0xb91   :  { %1045 = vadd.xlane.f32.xlu0 %v1044_v61  ;;  %v1047_v63 = vsel %vm418_vm10, %v3911_v62, 0.0  ;;  %v1170_v24 = vsel %vm1168_vm14, %v1167_v21, %v1155_v18  ;;  %v3050_v21 = vld [vmem:[%s4847_s11] ss:$0 sm:$0xff] }
 0xb95   :  { %1048 = vadd.xlane.f32.xlu0 %v1047_v63  ;;  %v1433_v63 = vld [vmem:[%s4850_s14 + $0x28] sm:$0xff] }
 0xbab   :  { %1144 = vrot.lane.b32.xlu0 %v4356_v59, %s4861_s19  ;;  %v1175_v59 = vld [vmem:[%s4844_s8 + $0x8] sm:$0xff]  ;;  %s4888_s19 = smov 16  }
 0xbac   :  { %v3621_v10 = vpack.c.bf16 %v1175_v59, %v1174_v8 }
 0xbae   :  { %3622 = vmatprep.subr.bf16.mxu1 %v3621_v10 }
 0xbaf   :  { %3624 = vmatpush3.bf16.msra.mxu1 %v3621_v10 }
 0xbb0   :  { %3626 = vmatprep.subr.bf16.mxu1 %v3625_v12 }
 0xbb3   :  { %3628 = vmatpush3.bf16.msra.mxu1 %v3625_v12 }
 0xbb4   :  { %3638 = vmatprep.subr.bf16.mxu1 %v3637_v32 }
 0xc1e   :  { %v1046_v0 = vpop.xlane.xlu0 %1045 }
 0xc1f   :  { %3912 = vrcp.f32 %v1046_v0 }
 0xc22   :  { %v1049_v1 = vpop.xlane.xlu0 %1048 }
 0xc23   :  { %3914 = vrcp.f32 %v1049_v1 }
 0xc26   :  { %v1145_v30 = vpop.permute.xlu0 %1144 }
 0xc27   :  { %v1166_v19 = vsel %vm326_vm7, %v4326_v15, %v1145_v30  ;;  %v3046_v15 = vld [vmem:[%s4845_s9] ss:$0 sm:$0xff] }
 0xc28   :  { %v1169_v22 = vsel %vm1168_vm14, %v1166_v19, %v1153_v31  ;;  %v3049_v19 = vld [vmem:[%s4846_s10] ss:$0 sm:$0xff] }
 0xc29   :  { %v3913_v2 = vpop.eup %3912 }
 0xc2a   :  { %v1052_v4 = vmul.f32 %v3913_v2, %v3909_v58  ;;  %v1431_v58 = vld [vmem:[%s4850_s14 + $0x18] sm:$0xff] }
 0xc2b   :  { %v3641_v61 = vpack.c.bf16 %v1431_v58, %v1430_v60 }
 0xc2c   :  { %3338 = vmatprep.mubr.msk.f32.mxu0 %vm414_vm9, %v1052_v4 }
 0xc2d   :  { %v3915_v6 = vpop.eup %3914 }
 0xc2e   :  { %v1053_v7 = vmul.f32 %v3915_v6, %v3911_v62  ;;  %v1432_v62 = vld [vmem:[%s4850_s14 + $0x20] sm:$0xff] }
 0xc2f   :  { %v3645_v0 = vpack.c.bf16 %v1433_v63, %v1432_v62 }
 0xc30   :  { %3339 = vmatmul.mubr.msk.f32.vlgmr.msra.gmra.mrb[8].mxu0 %vm414_vm9, %v1053_v7 }
 0xc31   :  { %3632 = vmatpush3.bf16.msra.mxu0 %v3629_v53 }
 0xc32   :  { %3634 = vmatprep.subr.bf16.mxu0 %v3633_v55 }
 0xc35   :  { %3636 = vmatpush3.bf16.msra.mxu0 %v3633_v55 }
 0xd03   :  { %v3340_v13 = vpop.f32.mrb[8].mxu0 }
 0xd04   :  { %1162 = vrot.lane.b32.xlu1 %v3340_v13, %s4867_s2  ;;  %v1133_v16 = vpop.f32.mrb[9].mxu0 }
 0xd05   :  { %1160 = vrot.lane.b32.xlu0 %v1133_v16, %s4867_s2 }
 0xd76   :  { %v1163_v20 = vpop.permute.xlu1 %1162 }
 0xd77   :  { %v1161_v23 = vpop.permute.xlu0 %1160  ;;  %v1173_v26 = vsel %vm1171_vm15, %v1170_v24, %v1163_v20 }
 0xd78   :  { %v1172_v25 = vsel %vm1171_vm15, %v1169_v22, %v1161_v23 }
 0xd79   :  { %3349 = vmatprep.mubr.msk.f32.mxu1 %vm176_vm1, %v1172_v25 }
 0xd7a   :  { %3350 = vmatmul.mubr.msk.f32.vlgmr.msra.gmra.mrb[12].mxu1 %vm176_vm1, %v1173_v26 }
 0xd7b   :  { %3640 = vmatpush3.bf16.msra.mxu1 %v3637_v32 }
 0xd7c   :  { %3642 = vmatprep.subr.bf16.mxu1 %v3641_v61 }
 0xd7f   :  { %3644 = vmatpush3.bf16.msra.mxu1 %v3641_v61 }
 0xd80   :  { %3646 = vmatprep.subr.bf16.mxu1 %v3645_v0 }
 0xd83   :  { %3648 = vmatpush3.bf16.msra.mxu1 %v3645_v0  ;;  %v3054_v0 = vld [vmem:[%s4851_s15] ss:$0 sm:$0xff] }
 0xe4d   :  { %v3351_v27 = vpop.f32.mrb[12].mxu1 }
 0xe4e   :  { %v1263_v28 = vadd.f32 %v3351_v27, %v3046_v15  ;;  %v1257_v14 = vpop.f32.mrb[13].mxu1  ;;  %v1434_v27 = vld [vmem:[%s4850_s14 + $0x30] sm:$0xff] }
 0xe4f   :  { %v1258_v29 = vadd.f32 %v3046_v15, %v1257_v14 }
 0xe50   :  { %v4432_v33 = vadd.f32 %v1263_v28, %v4232_v48  ;;  %v1435_v28 = vld [vmem:[%s4850_s14 + $0x38] sm:$0xff] }
 0xe51   :  { %v4435_v34 = vadd.f32 %v1258_v29, %v4225_v43  ;;  %v3649_v14 = vpack.c.bf16 %v1435_v28, %v1434_v27  ;;  %v1436_v29 = vld [vmem:[%s4850_s14 + $0x40] sm:$0xff] }
 0xe52   :  { %v1273_v35 = vsel %vm180_vm2, %v4432_v33, 0.0 }
 0xe53   :  { %1274 = vadd.xlane.f32.xlu1 %v1273_v35  ;;  %v1270_v37 = vsel %vm176_vm1, %v4435_v34, 0.0  ;;  %3650 = vmatprep.subr.bf16.mxu1 %v3649_v14  ;;  %v1437_v35 = vld [vmem:[%s4850_s14 + $0x48] sm:$0xff] }
 0xe54   :  { %1271 = vadd.xlane.f32.xlu0 %v1270_v37  ;;  %3652 = vmatpush3.bf16.msra.mxu1 %v3649_v14  ;;  %v3653_v37 = vpack.c.bf16 %v1437_v35, %v1436_v29 }
 0xe56   :  { %3654 = vmatprep.subr.bf16.mxu1 %v3653_v37 }
 0xe58   :  { %3656 = vmatpush3.bf16.msra.mxu1 %v3653_v37 }
 0xee0   :  { %v1275_v38 = vpop.xlane.xlu1 %1274 }
 0xee1   :  { %v1277_v39 = vmul.f32 0.03125, %v1275_v38  ;;  %v1272_v41 = vpop.xlane.xlu0 %1271  ;;  %v1438_v38 = vld [vmem:[%s4850_s14 + $0x50] sm:$0xff] }
 0xee2   :  { %v1276_v42 = vmul.f32 0.03125, %v1272_v41 }
 0xee3   :  { %v4442_v45 = vsub.f32 %v4432_v33, %v1277_v39  ;;  %v1439_v39 = vld [vmem:[%s4850_s14 + $0x58] sm:$0xff] }
 0xee4   :  { %v1278_v48 = vsub.f32 %v4435_v34, %v1276_v42  ;;  %v3657_v41 = vpack.c.bf16 %v1439_v39, %v1438_v38  ;;  %v1440_v42 = vld [vmem:[%s4850_s14 + $0x60] sm:$0xff] }
 0xee5   :  { %v1281_v47 = vmul.f32 %v4442_v45, %v4442_v45 }
 0xee6   :  { %v1280_v46 = vmul.f32 %v1278_v48, %v1278_v48  ;;  %3658 = vmatprep.subr.bf16.mxu1 %v3657_v41 }
 0xee7   :  { %v1285_v49 = vsel %vm180_vm2, %v1281_v47, 0.0  ;;  %3660 = vmatpush3.bf16.msra.mxu1 %v3657_v41 }
 0xee8   :  { %v1282_v43 = vsel %vm176_vm1, %v1280_v46, 0.0  ;;  %v1442_v46 = vld [vmem:[%s4850_s14 + $0x70] sm:$0xff] }
 0xee9   :  { %1283 = vadd.xlane.f32.xlu0 %v1282_v43  ;;  %v1443_v43 = vld [vmem:[%s4850_s14 + $0x78] sm:$0xff] }
 0xeea   :  { %v3665_v47 = vpack.c.bf16 %v1443_v43, %v1442_v46  ;;  %v3057_v43 = vld [vmem:[%s4841_s5 + $0x1] ss:$0 sm:$0xff]  ;;  %s4881_s5 = smov 64  }
 0xeed   :  { %1286 = vadd.xlane.f32.xlu0 %v1285_v49  ;;  %v3051_v49 = vld [vmem:[%s4849_s13] ss:$0 sm:$0xff] }
 0xf76   :  { %v1284_v1 = vpop.xlane.xlu0 %1283 }
 0xf77   :  { %v1288_v2 = vmul.f32 0.03125, %v1284_v1 }
 0xf79   :  { %v1290_v4 = vadd.f32 1e-05, %v1288_v2 }
 0xf7a   :  { %v1287_v6 = vpop.xlane.xlu0 %1286 }
 0xf7b   :  { %3916 = vrsqrt.f32 %v1290_v4  ;;  %v1289_v7 = vmul.f32 0.03125, %v1287_v6  ;;  %vm1294_vm0 = vcmp.eq.f32.partialorder %v1290_v4, inf  ;;  %v1297_v10 = vand.u32 2147483648, %v1290_v4 }
 0xf7c   :  { %vm1296_vm3 = vcmp.eq.f32.partialorder %v1290_v4, 0.0 }
 0xf7d   :  { %v1291_v8 = vadd.f32 1e-05, %v1289_v7 }
 0xf7f   :  { %3918 = vrsqrt.f32 %v1291_v8  ;;  %vm1301_vm4 = vcmp.eq.f32.partialorder %v1291_v8, inf  ;;  %v1304_v17 = vand.u32 2147483648, %v1291_v8  ;;  %vm1303_vm5 = vcmp.eq.f32.partialorder %v1291_v8, 0.0 }
 0xf85   :  { %v3917_v59 = vpop.eup %3916 }
 0xf86   :  { %v1293_v9 = vmul.f32 %v3917_v59, %v1290_v4 }
 0xf88   :  { %v1295_v11 = vsel %vm1294_vm0, %v1290_v4, %v1293_v9 }
 0xf89   :  { %v1298_v12 = vsel %vm1296_vm3, %v1297_v10, %v1295_v11  ;;  %v3919_v13 = vpop.eup %3918 }
 0xf8a   :  { %3920 = vrcp.f32 %v1298_v12  ;;  %v1300_v16 = vmul.f32 %v3919_v13, %v1291_v8 }
 0xf8c   :  { %v1302_v31 = vsel %vm1301_vm4, %v1291_v8, %v1300_v16 }
 0xf8d   :  { %v1305_v30 = vsel %vm1303_vm5, %v1304_v17, %v1302_v31 }
 0xf8e   :  { %3922 = vrcp.f32 %v1305_v30 }
 0xf94   :  { %v3921_v18 = vpop.eup %3920 }
 0xf95   :  { %v1307_v20 = vmul.f32 %v3921_v18, %v1278_v48  ;;  %v3059_v18 = vld [vmem:[%s4843_s7 + $0x20] sm:$0xff] }
 0xf97   :  { %v1316_v22 = vmul.f32 %v3049_v19, %v1307_v20  ;;  %v3061_v20 = vld [vmem:[%s4843_s7 + $0x30] sm:$0xff] }
 0xf98   :  { %v3923_v23 = vpop.eup %3922 }
 0xf99   :  { %v1324_v24 = vadd.f32 %v3050_v21, %v1316_v22  ;;  %v1309_v25 = vmul.f32 %v3923_v23, %v4442_v45  ;;  %v1441_v45 = vld [vmem:[%s4850_s14 + $0x68] sm:$0xff]  ;;  %v3062_v22 = vld [vmem:[%s4843_s7 + $0x38] sm:$0xff] }
 0xf9a   :  { %v3661_v48 = vpack.c.bf16 %v1441_v45, %v1440_v42  ;;  %v3673_v23 = vpack.c.bf16 %v3062_v22, %v3061_v20 }
 0xf9b   :  { %3360 = vmatprep.mubr.msk.f32.mxu0 %vm176_vm1, %v1324_v24  ;;  %v1317_v26 = vmul.f32 %v3049_v19, %v1309_v25  ;;  %v3060_v19 = vld [vmem:[%s4843_s7 + $0x28] sm:$0xff] }
 0xf9c   :  { %3662 = vmatprep.subr.bf16.mxu1 %v3661_v48 }
 0xf9d   :  { %v1325_v15 = vadd.f32 %v3050_v21, %v1317_v26  ;;  %3664 = vmatpush3.bf16.msra.mxu1 %v3661_v48  ;;  %v3669_v21 = vpack.c.bf16 %v3060_v19, %v3059_v18 }
 0xf9e   :  { %3666 = vmatprep.subr.bf16.mxu1 %v3665_v47 }
 0xf9f   :  { %3361 = vmatmul.mubr.msk.f32.vlgmr.msra.gmra.mrb[10].mxu0 %vm176_vm1, %v1325_v15  ;;  %3670 = vmatprep.subr.bf16.mxu0 %v3669_v21 }
 0xfa0   :  { %3672 = vmatpush3.bf16.msra.mxu0 %v3669_v21 }
 0xfa1   :  { %3668 = vmatpush3.bf16.msra.mxu1 %v3665_v47  ;;  %3674 = vmatprep.subr.bf16.mxu0 %v3673_v23 }
 0xfa4   :  { %3676 = vmatpush3.bf16.msra.mxu0 %v3673_v23 }
0x1072   :  { %v3362_v50 = vpop.f32.mrb[10].mxu0 }
0x1073   :  { %v1415_v51 = vadd.f32 %v3362_v50, %v3051_v49  ;;  %v1409_v52 = vpop.f32.mrb[11].mxu0 }
0x1074   :  { %v1410_v53 = vadd.f32 %v3051_v49, %v1409_v52 }
0x1075   :  { %v1421_v54 = vmul.f32 0.70710677, %v1415_v51  ;;  %v1419_v61 = vmul.f32 0.5, %v1415_v51  ;;  %v3058_v51 = vld [vmem:[%s4842_s6 + $0x1] ss:$0 sm:$0xff]  ;;  %s4889_s6 = smov 24  }
0x1076   :  { %v1420_v55 = vmul.f32 0.70710677, %v1410_v53  ;;  %v1418_v32 = vmul.f32 0.5, %v1410_v53 }
0x1077   :  { %3924 = verf.f32 %v1421_v54 }
0x1078   :  { %3926 = verf.f32 %v1420_v55 }
0x1081   :  { %v3925_v56 = vpop.eup %3924 }
0x1082   :  { %v3927_v57 = vpop.eup %3926  ;;  %v1425_v60 = vadd.f32 1.0, %v3925_v56 }
0x1083   :  { %v1424_v58 = vadd.f32 1.0, %v3927_v57 }
0x1084   :  { %v1427_v63 = vmul.f32 %v1425_v60, %v1419_v61 }
0x1085   :  { %v1426_v62 = vmul.f32 %v1424_v58, %v1418_v32 }
0x1087   :  { %3395 = vmatprep.mubr.f32.mxu1 %v1426_v62 }
0x1088   :  { %3396 = vmatmul.mubr.f32.vlgmr.msra.gmra.mrb[14].mxu1 %v1427_v63 }
0x115b   :  { %v3397_v1 = vpop.f32.mrb[14].mxu1 }
0x115c   :  { %v1523_v2 = vadd.f32 %v3397_v1, %v3054_v0  ;;  %v1517_v4 = vpop.f32.mrb[15].mxu1 }
0x115d   :  { %v1518_v6 = vadd.f32 %v3054_v0, %v1517_v4 }
0x115e   :  { %v4525_v7 = vadd.f32 %v1523_v2, %v4432_v33 }
0x115f   :  { %v4528_v8 = vadd.f32 %v1518_v6, %v4435_v34 }
0x1160   :  { %v1535_v59 = vsel %vm180_vm2, %v4525_v7, 0.0 }
0x1161   :  { %1536 = vadd.xlane.f32.xlu1 %v1535_v59  ;;  %v1532_v9 = vsel %vm176_vm1, %v4528_v8, 0.0 }
0x1162   :  { %1533 = vadd.xlane.f32.xlu0 %v1532_v9 }
0x11ee   :  { %v1537_v10 = vpop.xlane.xlu1 %1536 }
0x11ef   :  { %v1539_v11 = vmul.f32 0.03125, %v1537_v10  ;;  %v1534_v12 = vpop.xlane.xlu0 %1533 }
0x11f0   :  { %v1538_v13 = vmul.f32 0.03125, %v1534_v12 }
0x11f1   :  { %v1541_v16 = vsub.f32 %v4525_v7, %v1539_v11 }
0x11f2   :  { %v1540_v33 = vsub.f32 %v4528_v8, %v1538_v13 }
0x11f3   :  { %v1543_v17 = vmul.f32 %v1541_v16, %v1541_v16 }
0x11f4   :  { %v1542_v31 = vmul.f32 %v1540_v33, %v1540_v33 }
0x11f5   :  { %v1547_v34 = vsel %vm180_vm2, %v1543_v17, 0.0 }
0x11f6   :  { %1548 = vadd.xlane.f32.xlu1 %v1547_v34  ;;  %v1544_v30 = vsel %vm176_vm1, %v1542_v31, 0.0 }
0x11f7   :  { %1545 = vadd.xlane.f32.xlu0 %v1544_v30 }
0x1283   :  { %v1549_v24 = vpop.xlane.xlu1 %1548 }
0x1284   :  { %v1551_v25 = vmul.f32 0.03125, %v1549_v24  ;;  %v1546_v26 = vpop.xlane.xlu0 %1545 }
0x1285   :  { %v1550_v15 = vmul.f32 0.03125, %v1546_v26 }
0x1286   :  { %v1553_v27 = vadd.f32 1e-05, %v1551_v25 }
0x1287   :  { %v1552_v28 = vadd.f32 1e-05, %v1550_v15 }
0x1288   :  { %3928 = vrsqrt.f32 %v1553_v27  ;;  %vm1563_vm6 = vcmp.eq.f32.partialorder %v1553_v27, inf  ;;  %v1566_v37 = vand.u32 2147483648, %v1553_v27  ;;  %vm1565_vm11 = vcmp.eq.f32.partialorder %v1553_v27, 0.0 }
0x1289   :  { %3930 = vrsqrt.f32 %v1552_v28  ;;  %vm1556_vm12 = vcmp.eq.f32.partialorder %v1552_v28, inf  ;;  %v1559_v41 = vand.u32 2147483648, %v1552_v28  ;;  %vm1558_vm0 = vcmp.eq.f32.partialorder %v1552_v28, 0.0 }
0x1292   :  { %v3929_v14 = vpop.eup %3928 }
0x1293   :  { %v3931_v29 = vpop.eup %3930  ;;  %v1562_v35 = vmul.f32 %v3929_v14, %v1553_v27 }
0x1294   :  { %v1555_v38 = vmul.f32 %v3931_v29, %v1552_v28 }
0x1295   :  { %v1564_v39 = vsel %vm1563_vm6, %v1553_v27, %v1562_v35 }
0x1296   :  { %v1567_v42 = vsel %vm1565_vm11, %v1566_v37, %v1564_v39  ;;  %v1557_v45 = vsel %vm1556_vm12, %v1552_v28, %v1555_v38 }
0x1297   :  { %3932 = vrcp.f32 %v1567_v42  ;;  %v1560_v48 = vsel %vm1558_vm0, %v1559_v41, %v1557_v45 }
0x1298   :  { %3934 = vrcp.f32 %v1560_v48 }
0x12a1   :  { %v3933_v46 = vpop.eup %3932 }
0x12a2   :  { %v3935_v47 = vpop.eup %3934  ;;  %v1571_v49 = vmul.f32 %v3933_v46, %v1541_v16 }
0x12a3   :  { %v1569_v50 = vmul.f32 %v3935_v47, %v1540_v33 }
0x12a4   :  { %v1579_v52 = vmul.f32 %v3057_v43, %v1571_v49 }
0x12a5   :  { %v1578_v53 = vmul.f32 %v3057_v43, %v1569_v50 }
0x12a6   :  { %v1587_v55 = vadd.f32 %v3058_v51, %v1579_v52 }
0x12a7   :  { %v1586_v54 = vadd.f32 %v3058_v51, %v1578_v53  ;;  %v4621_v53 = vld [vmem:[%s4839_s3 + $0x8] sm:$0x3] }
0x12a9   :  { %3406 = vmatprep.mubr.msk.f32.mxu0 %vm176_vm1, %v1586_v54 }
0x12aa   :  { %3407 = vmatmul.mubr.msk.f32.vlgmr.msra.gmra.mrb[12].mxu0 %vm176_vm1, %v1587_v55  ;;  %v4627_v55 = vld [vmem:[%s4839_s3] sm:$0xff]  ;;  %s4882_s3 = smov 48  }
0x137d   :  { %v4558_v56 = vpop.f32.mrb[12].mxu0 }
0x137e   :  { %v4560_v57 = vpop.f32.mrb[13].mxu0 }
0x137f   :  { %3413 = vmatprep.mubr.msk.f32.mxu0 %vm326_vm7, %v4560_v57  ;;  %v4566_v60 = vpack.i.bf16 %v4558_v56, %v4560_v57 }
0x1381   :  { %3837 = vrot.lane.b32.xlu0 %v4566_v60, %s4011_s1 }
0x1385   :  { %3847 = vrot.lane.b32.xlu0 %v4566_v60, %s4012_s20 }
0x1389   :  { %1877 = vrot.lane.b32.xlu0 %v4560_v57, %s4013_s21 }
0x138d   :  { %3852 = vrot.lane.b32.xlu0 %v4566_v60, %s4018_s27  ;;  %s4884_s27 = smov 72  }
0x1391   :  { %2082 = vrot.lane.b32.xlu0 %v4560_v57, %s4017_s26 }
0x13f3   :  { %v3838_v32 = vpop.permute.xlu0 %3837 }
0x13f4   :  { %v3840_v58 = vunpack.i.h.bf16 %v3838_v32  ;;  %v3839_v61 = vunpack.i.l.bf16 %v3838_v32 }
0x13f6   :  { %v3677_v62 = vpack.c.bf16 %v3840_v58, %v3839_v61 }
0x13f7   :  { %v3848_v63 = vpop.permute.xlu0 %3847 }
0x13f8   :  { %3679 = vmatprep.subr.msk.bf16.mxu0 %vm4280_vm8, %v3677_v62  ;;  %v3850_v21 = vunpack.i.h.bf16 %v3848_v63 }
0x13f9   :  { %3682 = vmatpush3.bf16.xpose.msk.msra.mxu0 %vm4280_vm8, %v3677_v62 }
0x13fb   :  { %v1878_v0 = vpop.permute.xlu0 %1877 }
0x13ff   :  { %v3853_v1 = vpop.permute.xlu0 %3852 }
0x1400   :  { %v3855_v2 = vunpack.i.h.bf16 %v3853_v1  ;;  %v3854_v4 = vunpack.i.l.bf16 %v3853_v1  ;;  %3414 = vmatmul.mubr.msk.f32.vlgmr.msra.gmra.mrb[14].mxu0 %vm326_vm7, %v4558_v56 }
0x1402   :  { %v3701_v6 = vpack.c.bf16 %v3855_v2, %v3854_v4 }
0x1403   :  { %v2083_v59 = vpop.permute.xlu0 %2082 }
0x1404   :  { %3703 = vmatprep.subr.msk.bf16.mxu1 %vm4280_vm8, %v3701_v6  ;;  %3441 = vmatprep.mubr.msk.f32.mxu1 %vm326_vm7, %v2083_v59 }
0x1405   :  { %3706 = vmatpush3.bf16.xpose.msk.msra.mxu1 %vm4280_vm8, %v3701_v6 }
0x14d3   :  { %v3415_v9 = vpop.f32.mrb[14].mxu0 }
0x14d4   :  { %v1754_v10 = vpop.f32.mrb[15].mxu0  ;;  %v1764_v11 = vmul.f32 0.35355338, %v3415_v9 }
0x14d5   :  { %v1763_v12 = vmul.f32 0.35355338, %v1754_v10 }
0x14d6   :  { %v1766_v33 = vadd.f32 %v1764_v11, %v4298_v44 }
0x14d7   :  { %v1765_v13 = vadd.f32 %v1763_v12, %v4293_v40  ;;  %v3849_v40 = vunpack.i.l.bf16 %v3848_v63 }
0x14d8   :  { %v1770_v17 = vsel %vm418_vm10, %v1766_v33, -inf }
0x14d9   :  { %v1767_v16 = vsel %vm414_vm9, %v1765_v13, -inf  ;;  %v3689_v25 = vpack.c.bf16 %v3850_v21, %v3849_v40 }
0x14da   :  { %1768 = vmax.xlane.f32.xlu1 %v1767_v16 }
0x14de   :  { %1771 = vmax.xlane.f32.xlu1 %v1770_v17 }
0x14ef   :  { %3842 = vrot.lane.b32.xlu1 %v4566_v60, %s4881_s5 }
0x1567   :  { %v1769_v31 = vpop.xlane.xlu1 %1768 }
0x1568   :  { %v1773_v34 = vsub.f32 %v1765_v13, %v1769_v31 }
0x156a   :  { %v1775_v19 = vmul.f32 1.442695, %v1773_v34 }
0x156b   :  { %v1772_v30 = vpop.xlane.xlu1 %1771 }
0x156c   :  { %v1774_v18 = vsub.f32 %v1766_v33, %v1772_v30 }
0x156e   :  { %v1777_v20 = vmul.f32 1.442695, %v1774_v18 }
0x156f   :  { %v3843_v22 = vpop.permute.xlu1 %3842 }
0x1570   :  { %3936 = vpow2.f32 %v1777_v20  ;;  %v3845_v23 = vunpack.i.h.bf16 %v3843_v22  ;;  %v3844_v24 = vunpack.i.l.bf16 %v3843_v22 }
0x1571   :  { %3938 = vpow2.f32 %v1775_v19 }
0x1572   :  { %v3683_v44 = vpack.c.bf16 %v3845_v23, %v3844_v24 }
0x1574   :  { %3685 = vmatprep.subr.msk.bf16.mxu0 %vm4308_vm13, %v3683_v44 }
0x1575   :  { %3688 = vmatpush3.bf16.msk.msra.mxu0 %vm4308_vm13, %v3683_v44 }
0x1576   :  { %3691 = vmatprep.subr.msk.bf16.mxu0 %vm4280_vm8, %v3689_v25 }
0x157a   :  { %v3937_v26 = vpop.eup %3936 }
0x157b   :  { %v1782_v15 = vsel %vm418_vm10, %v3937_v26, 0.0  ;;  %v3939_v27 = vpop.eup %3938 }
0x157c   :  { %1783 = vadd.xlane.f32.xlu1 %v1782_v15  ;;  %v1779_v28 = vsel %vm414_vm9, %v3939_v27, 0.0 }
0x1580   :  { %1780 = vadd.xlane.f32.xlu1 %v1779_v28 }
0x1591   :  { %1879 = vrot.lane.b32.xlu1 %v4558_v56, %s4013_s21 }
0x1595   :  { %2084 = vrot.lane.b32.xlu1 %v4558_v56, %s4017_s26  ;;  %s4883_s26 = smov 56  }
0x1609   :  { %v1784_v14 = vpop.xlane.xlu1 %1783 }
0x160a   :  { %3940 = vrcp.f32 %v1784_v14 }
0x160d   :  { %v1781_v29 = vpop.xlane.xlu1 %1780 }
0x160e   :  { %3942 = vrcp.f32 %v1781_v29 }
0x1611   :  { %v1880_v35 = vpop.permute.xlu1 %1879 }
0x1614   :  { %v3941_v38 = vpop.eup %3940 }
0x1615   :  { %v2085_v37 = vpop.permute.xlu1 %2084  ;;  %v1788_v42 = vmul.f32 %v3941_v38, %v3937_v26 }
0x1616   :  { %3442 = vmatmul.mubr.msk.f32.vlgmr.msra.gmra.mrb[16].mxu1 %vm326_vm7, %v2085_v37 }
0x1618   :  { %v3943_v39 = vpop.eup %3942 }
0x1619   :  { %v1787_v41 = vmul.f32 %v3943_v39, %v3939_v27 }
0x161b   :  { %3420 = vmatprep.mubr.msk.f32.mxu0 %vm414_vm9, %v1787_v41 }
0x161c   :  { %3421 = vmatmul.mubr.msk.f32.vlgmr.msra.gmra.mrb[16].mxu0 %vm414_vm9, %v1788_v42 }
0x161d   :  { %3694 = vmatpush3.bf16.xpose.msk.msra.mxu0 %vm4280_vm8, %v3689_v25  ;;  %3427 = vmatprep.mubr.msk.f32.mxu0 %vm326_vm7, %v1878_v0 }
0x1624   :  { %3428 = vmatmul.mubr.msk.f32.vlgmr.msra.gmra.mrb[18].mxu0 %vm326_vm7, %v1880_v35 }
0x16e9   :  { %v3443_v45 = vpop.f32.mrb[16].mxu1 }
0x16ea   :  { %v2164_v48 = vpop.f32.mrb[17].mxu1  ;;  %v2174_v61 = vmul.f32 0.35355338, %v3443_v45 }
0x16eb   :  { %v2173_v51 = vmul.f32 0.35355338, %v2164_v48 }
0x16ec   :  { %v2176_v1 = vadd.f32 %v4621_v53, %v2174_v61 }
0x16ed   :  { %v2175_v63 = vadd.f32 %v4627_v55, %v2173_v51 }
0x16ee   :  { %v2180_v2 = vsel %vm418_vm10, %v2176_v1, -inf }
0x16ef   :  { %v4614_v46 = vpop.f32.mrb[16].mxu0  ;;  %v2177_v0 = vsel %vm414_vm9, %v2175_v63, -inf }
0x16f0   :  { %v4616_v43 = vpop.f32.mrb[17].mxu0 }
0x16f7   :  { %v3429_v47 = vpop.f32.mrb[18].mxu0 }
0x16f8   :  { %v1969_v49 = vmul.f32 0.35355338, %v3429_v47  ;;  %v1959_v50 = vpop.f32.mrb[19].mxu0 }
0x16f9   :  { %v1968_v52 = vmul.f32 0.35355338, %v1959_v50 }
0x16fa   :  { %v1971_v54 = vadd.f32 %v4621_v53, %v1969_v49 }
0x16fb   :  { %v1970_v32 = vadd.f32 %v4627_v55, %v1968_v52 }
0x16fc   :  { %v1975_v58 = vsel %vm418_vm10, %v1971_v54, -inf }
0x16fd   :  { %1976 = vmax.xlane.f32.xlu1 %v1975_v58  ;;  %v1972_v62 = vsel %vm414_vm9, %v1970_v32, -inf }
0x16fe   :  { %1973 = vmax.xlane.f32.xlu0 %v1972_v62 }
0x1702   :  { %2178 = vmax.xlane.f32.xlu0 %v2177_v0 }
0x1706   :  { %2181 = vmax.xlane.f32.xlu0 %v2180_v2 }
0x178a   :  { %v1977_v59 = vpop.xlane.xlu1 %1976 }
0x178b   :  { %v1974_v4 = vpop.xlane.xlu0 %1973  ;;  %v1979_v11 = vsub.f32 %v1971_v54, %v1977_v59 }
0x178c   :  { %v1978_v6 = vsub.f32 %v1970_v32, %v1974_v4 }
0x178d   :  { %v1982_v17 = vmul.f32 1.442695, %v1979_v11 }
0x178e   :  { %v1980_v12 = vmul.f32 1.442695, %v1978_v6 }
0x178f   :  { %v2179_v9 = vpop.xlane.xlu0 %2178 }
0x1790   :  { %v2183_v10 = vsub.f32 %v2175_v63, %v2179_v9 }
0x1792   :  { %v2185_v13 = vmul.f32 1.442695, %v2183_v10 }
0x1793   :  { %v2182_v16 = vpop.xlane.xlu0 %2181 }
0x1794   :  { %3944 = vpow2.f32 %v2185_v13  ;;  %v2184_v33 = vsub.f32 %v2176_v1, %v2182_v16 }
0x1795   :  { %3946 = vpow2.f32 %v1980_v12 }
0x1796   :  { %v2187_v31 = vmul.f32 1.442695, %v2184_v33 }
0x1798   :  { %3948 = vpow2.f32 %v2187_v31 }
0x1799   :  { %3950 = vpow2.f32 %v1982_v17 }
0x179e   :  { %v3945_v34 = vpop.eup %3944 }
0x179f   :  { %v2189_v30 = vsel %vm414_vm9, %v3945_v34, 0.0  ;;  %v3947_v18 = vpop.eup %3946 }
0x17a0   :  { %2190 = vadd.xlane.f32.xlu0 %v2189_v30  ;;  %v1984_v20 = vsel %vm414_vm9, %v3947_v18, 0.0 }
0x17a2   :  { %v3949_v19 = vpop.eup %3948 }
0x17a3   :  { %v2192_v21 = vsel %vm418_vm10, %v3949_v19, 0.0  ;;  %v3951_v22 = vpop.eup %3950 }
0x17a4   :  { %1985 = vadd.xlane.f32.xlu0 %v1984_v20  ;;  %2193 = vadd.xlane.f32.xlu1 %v2192_v21  ;;  %v1987_v40 = vsel %vm418_vm10, %v3951_v22, 0.0 }
0x17a8   :  { %1988 = vadd.xlane.f32.xlu1 %v1987_v40 }
0x17b9   :  { %3862 = vrot.lane.b32.xlu1 %v4566_v60, %s4882_s3 }
0x17ba   :  { %3857 = vrot.lane.b32.xlu0 %v4566_v60, %s4883_s26 }
0x17bd   :  { %3867 = vrot.lane.b32.xlu1 %v4566_v60, %s4884_s27 }
0x17be   :  { %2289 = vrot.lane.b32.xlu0 %v4558_v56, %s4885_s0 }
0x17c1   :  { %2287 = vrot.lane.b32.xlu1 %v4560_v57, %s4885_s0 }
0x182d   :  { %v2191_v23 = vpop.xlane.xlu0 %2190 }
0x1831   :  { %v2194_v24 = vpop.xlane.xlu1 %2193  ;;  %v1986_v44 = vpop.xlane.xlu0 %1985 }
0x1832   :  { %3952 = vrcp.f32 %v1986_v44  ;;  %v3095_v44 = vld [vmem:[%s4844_s8 + $0x30] sm:$0xff] }
0x1833   :  { %3954 = vrcp.f32 %v2191_v23  ;;  %v3093_v23 = vld [vmem:[%s4844_s8 + $0x20] sm:$0xff] }
0x1835   :  { %v1989_v25 = vpop.xlane.xlu1 %1988  ;;  %v3858_v26 = vpop.permute.xlu0 %3857 }
0x1836   :  { %3956 = vrcp.f32 %v1989_v25  ;;  %v3860_v15 = vunpack.i.h.bf16 %v3858_v26  ;;  %v3859_v27 = vunpack.i.l.bf16 %v3858_v26  ;;  %v3096_v26 = vld [vmem:[%s4844_s8 + $0x38] sm:$0xff] }
0x1837   :  { %3958 = vrcp.f32 %v2194_v24  ;;  %v3094_v24 = vld [vmem:[%s4844_s8 + $0x28] sm:$0xff] }
0x1838   :  { %v3695_v28 = vpack.c.bf16 %v3860_v15, %v3859_v27  ;;  %v3725_v25 = vpack.c.bf16 %v3094_v24, %v3093_v23  ;;  %v3729_v15 = vpack.c.bf16 %v3096_v26, %v3095_v44 }
0x1839   :  { %v3863_v14 = vpop.permute.xlu1 %3862  ;;  %v2290_v54 = vpop.permute.xlu0 %2289 }
0x183a   :  { %v3865_v29 = vunpack.i.h.bf16 %v3863_v14  ;;  %v3864_v35 = vunpack.i.l.bf16 %v3863_v14  ;;  %3697 = vmatprep.subr.msk.bf16.mxu0 %vm4308_vm13, %v3695_v28 }
0x183b   :  { %3700 = vmatpush3.bf16.msk.msra.mxu0 %vm4308_vm13, %v3695_v28 }
0x183c   :  { %v3707_v56 = vpack.c.bf16 %v3865_v29, %v3864_v35  ;;  %v3953_v57 = vpop.eup %3952 }
0x183d   :  { %v3868_v37 = vpop.permute.xlu1 %3867  ;;  %v1992_v38 = vmul.f32 %v3953_v57, %v3947_v18  ;;  %v3955_v39 = vpop.eup %3954 }
0x183e   :  { %3709 = vmatprep.subr.msk.bf16.mxu0 %vm4308_vm13, %v3707_v56  ;;  %v3870_v41 = vunpack.i.h.bf16 %v3868_v37  ;;  %v3869_v42 = vunpack.i.l.bf16 %v3868_v37  ;;  %v2197_v49 = vmul.f32 %v3955_v39, %v3945_v34 }
0x183f   :  { %3434 = vmatprep.mubr.msk.f32.mxu0 %vm414_vm9, %v1992_v38 }
0x1840   :  { %v3957_v45 = vpop.eup %3956  ;;  %v3713_v50 = vpack.c.bf16 %v3870_v41, %v3869_v42 }
0x1841   :  { %v1993_v48 = vmul.f32 %v3957_v45, %v3951_v22  ;;  %v3959_v47 = vpop.eup %3958  ;;  %v2288_v52 = vpop.permute.xlu1 %2287 }
0x1842   :  { %v2198_v51 = vmul.f32 %v3959_v47, %v3949_v19 }
0x1843   :  { %3435 = vmatmul.mubr.msk.f32.vlgmr.msra.gmra.mrb[20].mxu0 %vm414_vm9, %v1993_v48 }
0x1844   :  { %3712 = vmatpush3.bf16.msk.msra.mxu0 %vm4308_vm13, %v3707_v56  ;;  %3448 = vmatprep.mubr.msk.f32.mxu0 %vm414_vm9, %v2197_v49 }
0x1845   :  { %3715 = vmatprep.subr.msk.bf16.mxu0 %vm4280_vm8, %v3713_v50 }
0x1847   :  { %3449 = vmatmul.mubr.msk.f32.vlgmr.msra.gmra.mrb[22].mxu0 %vm414_vm9, %v2198_v51 }
0x1848   :  { %3455 = vmatprep.mubr.msk.f32.mxu0 %vm326_vm7, %v2288_v52 }
0x184d   :  { %3718 = vmatpush3.bf16.xpose.msk.msra.mxu0 %vm4280_vm8, %v3713_v50 }
0x1854   :  { %3456 = vmatmul.mubr.msk.f32.vlgmr.msra.gmra.mrb[24].mxu0 %vm326_vm7, %v2290_v54 }
0x1916   :  { %v3436_v32 = vpop.f32.mrb[20].mxu0 }
0x1917   :  { %v2073_v58 = vpop.f32.mrb[21].mxu0 }
0x191a   :  { %v3450_v61 = vpop.f32.mrb[22].mxu0 }
0x191b   :  { %v2278_v62 = vpop.f32.mrb[23].mxu0 }
0x1927   :  { %v3457_v63 = vpop.f32.mrb[24].mxu0 }
0x1928   :  { %v2379_v0 = vmul.f32 0.35355338, %v3457_v63  ;;  %v2369_v1 = vpop.f32.mrb[25].mxu0 }
0x1929   :  { %v2378_v2 = vmul.f32 0.35355338, %v2369_v1 }
0x192a   :  { %v2381_v4 = vadd.f32 %v4621_v53, %v2379_v0 }
0x192b   :  { %v2380_v6 = vadd.f32 %v4627_v55, %v2378_v2 }
0x192c   :  { %v2385_v59 = vsel %vm418_vm10, %v2381_v4, -inf }
0x192d   :  { %2386 = vmax.xlane.f32.xlu0 %v2385_v59  ;;  %v2382_v36 = vsel %vm414_vm9, %v2380_v6, -inf  ;;  %v3106_v59 = vld [vmem:[%s4848_s12 + $0x28] sm:$0xff] }
0x192e   :  { %2383 = vmax.xlane.f32.xlu1 %v2382_v36  ;;  %v3107_v36 = vld [vmem:[%s4848_s12 + $0x30] sm:$0xff] }
0x193f   :  { %3872 = vrot.lane.b32.xlu1 %v4566_v60, %s4886_s24 }
0x1943   :  { %2496 = vrot.lane.b32.xlu1 %v3436_v32, %s4887_s28 }
0x1947   :  { %2502 = vrot.lane.b32.xlu1 %v2278_v62, %s4888_s19 }
0x194b   :  { %2504 = vrot.lane.b32.xlu1 %v3450_v61, %s4888_s19 }
0x19ba   :  { %v2387_v9 = vpop.xlane.xlu0 %2386 }
0x19bb   :  { %v2389_v10 = vsub.f32 %v2381_v4, %v2387_v9  ;;  %v2384_v53 = vpop.xlane.xlu1 %2383 }
0x19bc   :  { %v2388_v11 = vsub.f32 %v2380_v6, %v2384_v53  ;;  %v3105_v6 = vld [vmem:[%s4848_s12 + $0x20] sm:$0xff] }
0x19bd   :  { %v2392_v55 = vmul.f32 1.442695, %v2389_v10  ;;  %v3733_v9 = vpack.c.bf16 %v3106_v59, %v3105_v6  ;;  %v3108_v10 = vld [vmem:[%s4848_s12 + $0x38] sm:$0xff] }
0x19be   :  { %v2390_v12 = vmul.f32 1.442695, %v2388_v11  ;;  %v3737_v53 = vpack.c.bf16 %v3108_v10, %v3107_v36  ;;  %v3113_v11 = vld [vmem:[%s4850_s14 + $0x80] sm:$0xff] }
0x19bf   :  { %v3873_v13 = vpop.permute.xlu1 %3872  ;;  %3734 = vmatprep.subr.bf16.mxu0 %v3733_v9 }
0x19c0   :  { %3960 = vpow2.f32 %v2390_v12  ;;  %v3875_v16 = vunpack.i.h.bf16 %v3873_v13  ;;  %v3874_v33 = vunpack.i.l.bf16 %v3873_v13  ;;  %3736 = vmatpush3.bf16.msra.mxu0 %v3733_v9  ;;  %v3115_v12 = vld [vmem:[%s4850_s14 + $0x90] sm:$0xff] }
0x19c1   :  { %3962 = vpow2.f32 %v2392_v55  ;;  %3738 = vmatprep.subr.bf16.mxu0 %v3737_v53  ;;  %v3114_v55 = vld [vmem:[%s4850_s14 + $0x88] sm:$0xff] }
0x19c2   :  { %v3719_v17 = vpack.c.bf16 %v3875_v16, %v3874_v33  ;;  %v3741_v13 = vpack.c.bf16 %v3114_v55, %v3113_v11  ;;  %v3116_v16 = vld [vmem:[%s4850_s14 + $0x98] sm:$0xff] }
0x19c3   :  { %v2497_v14 = vpop.permute.xlu1 %2496  ;;  %v3745_v33 = vpack.c.bf16 %v3116_v16, %v3115_v12  ;;  %v4027_v16 = vmov 0.0  }
0x19c4   :  { %3721 = vmatprep.subr.msk.bf16.mxu1 %vm4308_vm13, %v3719_v17  ;;  %v2517_v38 = vsel %vm326_vm7, %v4614_v46, %v2497_v14  ;;  %3740 = vmatpush3.bf16.msra.mxu0 %v3737_v53  ;;  %v3103_v14 = vld [vmem:[%s4846_s10 + $0x1] ss:$0 sm:$0xff]  ;;  %s4028_s10 = smov [#allocation2]  }
0x19c5   :  { %3724 = vmatpush3.bf16.msk.msra.mxu1 %vm4308_vm13, %v3719_v17  ;;  %3773 = vmatprep.subr.bf16.mxu0 %v4010_v3  ;;  %v3117_v3 = vld [vmem:[%s4850_s14 + $0xa0] sm:$0xff]  ;;  %v3118_v17 = vld [vmem:[%s4850_s14 + $0xa8] sm:$0xff]  ;;  %s3004_s26 = sshll.u32 %s4028_s10, 4  ;;  %s3005_s26 = int_to_ptr.vmem [resolvable:$true] %s3004_s26 }
0x19c6   :  { %3726 = vmatprep.subr.bf16.mxu1 %v3725_v25  ;;  %p3991_p1 = scmp.lt.s32.totalorder %s3005_s26, %s3005_s26 }
0x19c7   :  { %v2503_v29 = vpop.permute.xlu1 %2502 }
0x19ca   :  { %v3961_v60 = vpop.eup %3960 }
0x19cb   :  { %v2394_v31 = vsel %vm414_vm9, %v3961_v60, 0.0  ;;  %v3963_v34 = vpop.eup %3962  ;;  %v2505_v56 = vpop.permute.xlu1 %2504 }
0x19cc   :  { %2395 = vadd.xlane.f32.xlu0 %v2394_v31  ;;  %v2397_v30 = vsel %vm418_vm10, %v3963_v34, 0.0  ;;  %v2519_v42 = vsel %vm1168_vm14, %v2517_v38, %v2505_v56 }
0x19d0   :  { %2398 = vadd.xlane.f32.xlu0 %v2397_v30 }
0x19e6   :  { %2494 = vrot.lane.b32.xlu0 %v2073_v58, %s4887_s28 }
0x1a59   :  { %v2396_v18 = vpop.xlane.xlu0 %2395 }
0x1a5a   :  { %3964 = vrcp.f32 %v2396_v18 }
0x1a5d   :  { %v2399_v19 = vpop.xlane.xlu0 %2398 }
0x1a5e   :  { %3966 = vrcp.f32 %v2399_v19 }
0x1a61   :  { %v2495_v35 = vpop.permute.xlu0 %2494 }
0x1a62   :  { %v2516_v57 = vsel %vm326_vm7, %v4616_v43, %v2495_v35  ;;  %v3098_v43 = vld [vmem:[%s4845_s9 + $0x1] ss:$0 sm:$0xff] }
0x1a63   :  { %v2518_v39 = vsel %vm1168_vm14, %v2516_v57, %v2503_v29  ;;  %v3104_v35 = vld [vmem:[%s4847_s11 + $0x1] ss:$0 sm:$0xff]  ;;  %s3986_s11 = scalar_lea.vmem %s3005_s26, 32 }
0x1a64   :  { %v3965_v20 = vpop.eup %3964  ;;  %p3987_p0 = scmp.ne.s32.totalorder %s3005_s26, %s3986_s11  ;;  %p3992_p2 = scmp.lt.s32.totalorder %s3986_s11, %s3986_s11 }
0x1a65   :  { %v2402_v21 = vmul.f32 %v3965_v20, %v3961_v60  ;;  %v3749_v60 = vpack.c.bf16 %v3118_v17, %v3117_v3 }
0x1a66   :  { %p3993_p3 = por %p3992_p2, %p3991_p1 }
0x1a67   :  { %3462 = vmatprep.mubr.msk.f32.mxu1 %vm414_vm9, %v2402_v21 }
0x1a68   :  { %v3967_v22 = vpop.eup %3966  ;;  %p3994_p4 = pnand %p3993_p3, %p3987_p0 }
0x1a69   :  { %v2403_v40 = vmul.f32 %v3967_v22, %v3963_v34 }
0x1a6b   :  { %3463 = vmatmul.mubr.msk.f32.vlgmr.msra.gmra.mrb[18].mxu1 %vm414_vm9, %v2403_v40 }
0x1a6c   :  { %3728 = vmatpush3.bf16.msra.mxu1 %v3725_v25 }
0x1a6d   :  { %3730 = vmatprep.subr.bf16.mxu1 %v3729_v15 }
0x1a70   :  { %3732 = vmatpush3.bf16.msra.mxu1 %v3729_v15 }
0x1a71   :  { %3742 = vmatprep.subr.bf16.mxu1 %v3741_v13 }
0x1b3e   :  { %v3464_v27 = vpop.f32.mrb[18].mxu1 }
0x1b3f   :  { %2512 = vrot.lane.b32.xlu1 %v3464_v27, %s4889_s6  ;;  %v2483_v28 = vpop.f32.mrb[19].mxu1 }
0x1b40   :  { %2510 = vrot.lane.b32.xlu0 %v2483_v28, %s4889_s6 }
0x1bb1   :  { %v2513_v37 = vpop.permute.xlu1 %2512 }
0x1bb2   :  { %v2511_v41 = vpop.permute.xlu0 %2510  ;;  %v2521_v48 = vsel %vm1171_vm15, %v2519_v42, %v2513_v37  ;;  %v3119_v42 = vld [vmem:[%s4850_s14 + $0xb0] sm:$0xff] }
0x1bb3   :  { %v2520_v45 = vsel %vm1171_vm15, %v2518_v39, %v2511_v41 }
0x1bb4   :  { %3473 = vmatprep.mubr.msk.f32.mxu1 %vm176_vm1, %v2520_v45  ;;  %v3120_v45 = vld [vmem:[%s4850_s14 + $0xb8] sm:$0xff] }
0x1bb5   :  { %3474 = vmatmul.mubr.msk.f32.vlgmr.msra.gmra.mrb[20].mxu1 %vm176_vm1, %v2521_v48  ;;  %v3753_v48 = vpack.c.bf16 %v3120_v45, %v3119_v42 }
0x1bb6   :  { %3744 = vmatpush3.bf16.msra.mxu1 %v3741_v13 }
0x1bb7   :  { %3746 = vmatprep.subr.bf16.mxu1 %v3745_v33 }
0x1bba   :  { %3748 = vmatpush3.bf16.msra.mxu1 %v3745_v33  ;;  %v3130_v33 = vld [vmem:[%s4851_s15 + $0x1] ss:$0 sm:$0xff] }
0x1bbb   :  { %3750 = vmatprep.subr.bf16.mxu1 %v3749_v60 }
0x1bbe   :  { %3752 = vmatpush3.bf16.msra.mxu1 %v3749_v60 }
0x1bbf   :  { %3754 = vmatprep.subr.bf16.mxu1 %v3753_v48 }
0x1bc2   :  { %3756 = vmatpush3.bf16.msra.mxu1 %v3753_v48 }
0x1c88   :  { %v3475_v47 = vpop.f32.mrb[20].mxu1 }
0x1c89   :  { %v2613_v49 = vadd.f32 %v3475_v47, %v3098_v43  ;;  %v2607_v46 = vpop.f32.mrb[21].mxu1  ;;  %v3122_v47 = vld [vmem:[%s4850_s14 + $0xc8] sm:$0xff] }
0x1c8a   :  { %v2608_v50 = vadd.f32 %v3098_v43, %v2607_v46  ;;  %v3121_v43 = vld [vmem:[%s4850_s14 + $0xc0] sm:$0xff]  ;;  %v3123_v46 = vld [vmem:[%s4850_s14 + $0xd0] sm:$0xff] }
0x1c8b   :  { %v4714_v51 = vadd.f32 %v2613_v49, %v4525_v7  ;;  %v3757_v49 = vpack.c.bf16 %v3122_v47, %v3121_v43 }
0x1c8c   :  { %v4717_v52 = vadd.f32 %v2608_v50, %v4528_v8  ;;  %v3124_v50 = vld [vmem:[%s4850_s14 + $0xd8] sm:$0xff] }
0x1c8d   :  { %v2625_v54 = vsel %vm180_vm2, %v4714_v51, 0.0  ;;  %3758 = vmatprep.subr.bf16.mxu1 %v3757_v49 }
0x1c8e   :  { %2626 = vadd.xlane.f32.xlu1 %v2625_v54  ;;  %v2622_v32 = vsel %vm176_vm1, %v4717_v52, 0.0  ;;  %3760 = vmatpush3.bf16.msra.mxu1 %v3757_v49  ;;  %v3761_v54 = vpack.c.bf16 %v3124_v50, %v3123_v46 }
0x1c8f   :  { %2623 = vadd.xlane.f32.xlu0 %v2622_v32  ;;  %v3125_v32 = vld [vmem:[%s4850_s14 + $0xe0] sm:$0xff] }
0x1c90   :  { %3762 = vmatprep.subr.bf16.mxu1 %v3761_v54 }
0x1c92   :  { %3764 = vmatpush3.bf16.msra.mxu1 %v3761_v54 }
0x1d1b   :  { %v2627_v58 = vpop.xlane.xlu1 %2626 }
0x1d1c   :  { %v2629_v61 = vmul.f32 0.03125, %v2627_v58  ;;  %v2624_v62 = vpop.xlane.xlu0 %2623  ;;  %v3126_v58 = vld [vmem:[%s4850_s14 + $0xe8] sm:$0xff] }
0x1d1d   :  { %v2628_v63 = vmul.f32 0.03125, %v2624_v62  ;;  %v3127_v62 = vld [vmem:[%s4850_s14 + $0xf0] sm:$0xff] }
0x1d1e   :  { %v4724_v0 = vsub.f32 %v4714_v51, %v2629_v61  ;;  %v3765_v61 = vpack.c.bf16 %v3126_v58, %v3125_v32 }
0x1d1f   :  { %v2630_v7 = vsub.f32 %v4717_v52, %v2628_v63  ;;  %v3128_v63 = vld [vmem:[%s4850_s14 + $0xf8] sm:$0xff] }
0x1d20   :  { %v2633_v2 = vmul.f32 %v4724_v0, %v4724_v0  ;;  %3766 = vmatprep.subr.bf16.mxu1 %v3765_v61 }
0x1d21   :  { %v2632_v1 = vmul.f32 %v2630_v7, %v2630_v7  ;;  %3768 = vmatpush3.bf16.msra.mxu1 %v3765_v61 }
0x1d22   :  { %v2637_v4 = vsel %vm180_vm2, %v2633_v2, 0.0 }
0x1d23   :  { %v2634_v8 = vsel %vm176_vm1, %v2632_v1, 0.0 }
0x1d24   :  { %2635 = vadd.xlane.f32.xlu0 %v2634_v8 }
0x1d28   :  { %2638 = vadd.xlane.f32.xlu0 %v2637_v4 }
0x1db1   :  { %v2636_v31 = vpop.xlane.xlu0 %2635 }
0x1db2   :  { %v2640_v34 = vmul.f32 0.03125, %v2636_v31 }
0x1db4   :  { %v2642_v30 = vadd.f32 1e-05, %v2640_v34 }
0x1db5   :  { %v2639_v18 = vpop.xlane.xlu0 %2638 }
0x1db6   :  { %3968 = vrsqrt.f32 %v2642_v30  ;;  %v2641_v19 = vmul.f32 0.03125, %v2639_v18  ;;  %vm2646_vm7 = vcmp.eq.f32.partialorder %v2642_v30, inf  ;;  %v2649_v40 = vand.u32 2147483648, %v2642_v30 }
0x1db7   :  { %vm2648_vm8 = vcmp.eq.f32.partialorder %v2642_v30, 0.0 }
0x1db8   :  { %v2643_v20 = vadd.f32 1e-05, %v2641_v19  ;;  %v2884_v19 = vld [vmem:[%s4840_s4] sm:$0x3] }
0x1dba   :  { %3970 = vrsqrt.f32 %v2643_v20  ;;  %vm2653_vm10 = vcmp.eq.f32.partialorder %v2643_v20, inf  ;;  %v2656_v26 = vand.u32 2147483648, %v2643_v20  ;;  %vm2655_vm14 = vcmp.eq.f32.partialorder %v2643_v20, 0.0 }
0x1dc0   :  { %v3969_v21 = vpop.eup %3968 }
0x1dc1   :  { %v2645_v22 = vmul.f32 %v3969_v21, %v2642_v30 }
0x1dc3   :  { %v2647_v23 = vsel %vm2646_vm7, %v2642_v30, %v2645_v22 }
0x1dc4   :  { %v2650_v24 = vsel %vm2648_vm8, %v2649_v40, %v2647_v23  ;;  %v3971_v44 = vpop.eup %3970 }
0x1dc5   :  { %3972 = vrcp.f32 %v2650_v24  ;;  %v2652_v25 = vmul.f32 %v3971_v44, %v2643_v20 }
0x1dc7   :  { %v2654_v15 = vsel %vm2653_vm10, %v2643_v20, %v2652_v25 }
0x1dc8   :  { %v2657_v27 = vsel %vm2655_vm14, %v2656_v26, %v2654_v15 }
0x1dc9   :  { %3974 = vrcp.f32 %v2657_v27 }
0x1dcf   :  { %v3973_v28 = vpop.eup %3972 }
0x1dd0   :  { %v2659_v29 = vmul.f32 %v3973_v28, %v2630_v7  ;;  %v3110_v7 = vld [vmem:[%s4849_s13 + $0x1] ss:$0 sm:$0xff] }
0x1dd2   :  { %v2668_v56 = vmul.f32 %v3103_v14, %v2659_v29 }
0x1dd3   :  { %v3975_v57 = vpop.eup %3974 }
0x1dd4   :  { %v2676_v37 = vadd.f32 %v3104_v35, %v2668_v56  ;;  %v2661_v38 = vmul.f32 %v3975_v57, %v4724_v0  ;;  %v3769_v0 = vpack.c.bf16 %v3128_v63, %v3127_v62  ;;  %v3134_v57 = vld [vmem:[%s4853_s17] ss:$0 sm:$0xff] }
0x1dd6   :  { %3484 = vmatprep.mubr.msk.f32.mxu0 %vm176_vm1, %v2676_v37  ;;  %v2669_v39 = vmul.f32 %v3103_v14, %v2661_v38  ;;  %3770 = vmatprep.subr.bf16.mxu1 %v3769_v0 }
0x1dd7   :  { %3772 = vmatpush3.bf16.msra.mxu1 %v3769_v0 }
0x1dd8   :  { %v2677_v41 = vadd.f32 %v3104_v35, %v2669_v39  ;;  %v3133_v35 = vld [vmem:[%s4852_s16] ss:$0 sm:$0xff] }
0x1dda   :  { %3485 = vmatmul.mubr.msk.f32.vlgmr.msra.gmra.mrb[26].mxu0 %vm176_vm1, %v2677_v41  ;;  %vm4026_vm1 = vmmov 0  }
0x1ddb   :  { %3526 = vmatprep.mubr.msk.f32.mxu0 %vm4026_vm1, %v4027_v16 }
0x1ead   :  { %v3486_v1 = vpop.f32.mrb[26].mxu0 }
0x1eae   :  { %v2769_v8 = vadd.f32 %v3486_v1, %v3110_v7  ;;  %v2763_v2 = vpop.f32.mrb[27].mxu0 }
0x1eaf   :  { %v2764_v4 = vadd.f32 %v3110_v7, %v2763_v2 }
0x1eb0   :  { %v2775_v6 = vmul.f32 0.70710677, %v2769_v8  ;;  %v2773_v55 = vmul.f32 0.5, %v2769_v8 }
0x1eb1   :  { %v2774_v59 = vmul.f32 0.70710677, %v2764_v4  ;;  %v2772_v53 = vmul.f32 0.5, %v2764_v4 }
0x1eb2   :  { %3976 = verf.f32 %v2775_v6 }
0x1eb3   :  { %3978 = verf.f32 %v2774_v59 }
0x1ebc   :  { %v3977_v36 = vpop.eup %3976 }
0x1ebd   :  { %v3979_v9 = vpop.eup %3978  ;;  %v2779_v10 = vadd.f32 1.0, %v3977_v36 }
0x1ebe   :  { %v2778_v11 = vadd.f32 1.0, %v3979_v9 }
0x1ebf   :  { %v2781_v13 = vmul.f32 %v2779_v10, %v2773_v55 }
0x1ec0   :  { %v2780_v12 = vmul.f32 %v2778_v11, %v2772_v53 }
0x1ec2   :  { %3519 = vmatprep.mubr.f32.mxu1 %v2780_v12 }
0x1ec3   :  { %3520 = vmatmul.mubr.f32.vlgmr.msra.gmra.mrb[22].mxu1 %v2781_v13 }
0x1f96   :  { %v3521_v3 = vpop.f32.mrb[22].mxu1 }
0x1f97   :  { %v2879_v17 = vadd.f32 %v3521_v3, %v3130_v33  ;;  %v2873_v60 = vpop.f32.mrb[23].mxu1 }
0x1f98   :  { %v2874_v31 = vadd.f32 %v3130_v33, %v2873_v60 }
0x1f99   :  { %v2883_v34 = vadd.f32 %v2879_v17, %v4714_v51 }
0x1f9a   :  { %v2882_v30 = vadd.f32 %v2874_v31, %v4717_v52 }
0x1f9c   :  { %v3774_v18 = vpack.c.bf16 %v2883_v34, %v2882_v30 }
0x1f9e   :  { %3776 = vmatpush3.bf16.msk.msra.mxu0 %vm4308_vm13, %v3774_v18 }
0x1fa1   :  { %3527 = vmatmul.mubr.msk.f32.vlgmr.msra.gmra.mrb[28].mxu0 %vm414_vm9, %v2884_v19 }
0x2074   :  { %v2957_v20 = vpop.f32.mrb[28].mxu0 }
0x2075   :  { %v3528_v21 = vpop.f32.mrb[29].mxu0  ;;  %v2963_v22 = vsel %vm180_vm2, %v2957_v20, 0.0 }
0x2076   :  { %2964 = vadd.xlane.f32.xlu0 %v2963_v22 }
0x2103   :  { %v2965_v40 = vpop.xlane.xlu0 %2964 }
0x2104   :  { %v2966_v23 = vmul.f32 0.03125, %v2965_v40 }
0x2106   :  { %v2967_v51 = vsub.f32 %v2957_v20, %v2966_v23 }
0x2108   :  { %v2968_v24 = vmul.f32 %v2967_v51, %v2967_v51 }
0x210a   :  { %v2969_v52 = vsel %vm180_vm2, %v2968_v24, 0.0 }
0x210b   :  { %2970 = vadd.xlane.f32.xlu1 %v2969_v52 }
0x2198   :  { %v2971_v5 = vpop.xlane.xlu1 %2970 }
0x2199   :  { %v2972_v44 = vmul.f32 0.03125, %v2971_v5 }
0x219b   :  { %v2973_v25 = vadd.f32 1e-05, %v2972_v44 }
0x219d   :  { %3980 = vrsqrt.f32 %v2973_v25  ;;  %vm2976_vm13 = vcmp.eq.f32.partialorder %v2973_v25, inf  ;;  %v2979_v27 = vand.u32 2147483648, %v2973_v25  ;;  %vm2978_vm9 = vcmp.eq.f32.partialorder %v2973_v25, 0.0 }
0x21a7   :  { %v3981_v26 = vpop.eup %3980 }
0x21a8   :  { %v2975_v15 = vmul.f32 %v3981_v26, %v2973_v25 }
0x21aa   :  { %v2977_v28 = vsel %vm2976_vm13, %v2973_v25, %v2975_v15 }
0x21ab   :  { %v2980_v14 = vsel %vm2978_vm9, %v2979_v27, %v2977_v28 }
0x21ac   :  { %3982 = vrcp.f32 %v2980_v14 }
0x21b6   :  { %v3983_v29 = vpop.eup %3982 }
0x21b7   :  { %v2982_v56 = vmul.f32 %v3983_v29, %v2967_v51 }
0x21b9   :  { %v2989_v37 = vmul.f32 %v3133_v35, %v2982_v56 }
0x21bb   :  { %v2996_v38 = vadd.f32 %v3134_v57, %v2989_v37 }
0x21bd   :  { %2997 = vst.msk [vmem:[#allocation2] sm:$0x3] %vm180_vm2, %v2996_v38 }
0x21be   :  { %3997 = shalt.err (!%p3994_p4)
}
0x21bf   :  { %s3998_s0 = scalar_lea.hbm %s4854_s18, 32 }
0x21c0   :  { %p3999_p5 = scmp.ne.s32.totalorder %s4854_s18, %s3998_s0  ;;  %p4002_p6 = scmp.lt.u32.totalorder %s3998_s0, %s4854_s18 }
0x21c2   :  { %p4004_p7 = pnand %p4002_p6, %p3999_p5 }
0x21c4   :  { %4007 = shalt.err (!%p4004_p7)
}
0x21c5   :  { %3007 = dma.vmem_to_hbm [thread:$0]  %s3005_s26, 32, %s4854_s18, [#allocation3]  }
0x21c6   :  { %4008 = dma.done.wait [#allocation3], 32  }
0x21c7   :  { %4009 = vsyncadd [#allocation3], 4294967264 }
0x21c8   :  { %3011 = vsyncpa [#allocation3], 1 }

</bundles_post_ra>
